<compile_context>
chip_gen: v7x
topology: tpu7x:2x2x1
jax: 0.10.0
libtpu: 0.0.40
codegen_flags: <defaults>
</compile_context>

<pallas_src>
import math
import functools

import jax
import jax.numpy as jnp
from jax.experimental import pallas as pl
from jax.experimental.pallas import tpu as pltpu


# --------------------------------------------------------------------------- #
# small math helpers
# --------------------------------------------------------------------------- #
def _layernorm(v, g, b, eps=1e-5):
    mu = jnp.mean(v, axis=-1, keepdims=True)
    var = jnp.mean((v - mu) ** 2, axis=-1, keepdims=True)
    return (v - mu) * jax.lax.rsqrt(var + eps) * g + b


def _gelu_new(v):
    # HF / vLLM "gelu_new" (tanh approximation)
    return 0.5 * v * (1.0 + jnp.tanh(
        math.sqrt(2.0 / math.pi) * (v + 0.044715 * v * v * v)))


def _round_up(n, m):
    return ((n + m - 1) // m) * m


def _device_kind():
    try:
        return jax.devices()[0].device_kind.lower()
    except Exception:
        return ""


def _vmem_capacity_bytes(kind):
    try:
        return int(pltpu.get_tpu_info().vmem_capacity_bytes)
    except Exception:
        pass
    if "v7" in kind:
        return 64 * 1024 * 1024
    return 128 * 1024 * 1024      # v5e / v6e


def _default_block_p(P, kind):
    # v7x: 64 MiB VMEM -> smaller P-chunks; v6e: 128 MiB + 256-wide MXU ->
    # large 256-multiples; v5e: 128-lane MXU -> 128-multiples.
    if "v7" in kind:
        pref = 256
    elif "v6" in kind:
        pref = 1024
    else:
        pref = 512
    if P <= pref:
        return _round_up(P, 8)
    return pref


# --------------------------------------------------------------------------- #
# kernel
# --------------------------------------------------------------------------- #
def _aria_projector_kernel(
    # pipelined inputs
    x_ref, q_ref,
    # whole-array VMEM residents
    ln_kv_g_ref, ln_kv_b_ref,
    w_kv_ref,                       # (KV, 2E)  folded [k_proj@in_k | v_proj@in_v]
    w_ol_ref, b_ol_ref,             # folded out_proj @ linear (+ deferred b_iv)
    ln_f_g_ref, ln_f_b_ref,
    w_ffn_in_ref, w_ffn_out_ref,
    # output
    out_ref,
    # online-softmax scratch (persist across the P-chunk axis)
    m_sc, l_sc, acc_sc,
    *, num_heads, embed_dim, num_patches, block_p, mask_tail):
    pi = pl.program_id(2)

    @pl.when(pi == 0)
    def _init():
        m_sc[...] = jnp.full_like(m_sc, -jnp.inf)
        l_sc[...] = jnp.zeros_like(l_sc)
        acc_sc[...] = jnp.zeros_like(acc_sc)

    # ---- streamed chunk: ln_kv + fused K|V projection (biases folded away) ----
    x = x_ref[0].astype(jnp.float32)                                   # (TP, KV)
    x_norm = _layernorm(x, ln_kv_g_ref[...], ln_kv_b_ref[...]).astype(jnp.bfloat16)
    kv2 = jnp.dot(x_norm, w_kv_ref[...],
                  preferred_element_type=jnp.float32)                  # (TP, 2E)

    tp = kv2.shape[0]
    hd = embed_dim // num_heads
    k2 = kv2[:, :embed_dim]
    v2 = kv2[:, embed_dim:]
    kh = jnp.transpose(k2.reshape(tp, num_heads, hd), (1, 0, 2)).astype(jnp.bfloat16)
    vh = jnp.transpose(v2.reshape(tp, num_heads, hd), (1, 0, 2)).astype(jnp.bfloat16)
    qh = q_ref[...]                                # (H, TQ, hd) bf16, scale pre-folded

    # ---- online softmax (all heads batched) ----
    s = jnp.einsum("hqd,hkd->hqk", qh, kh,
                   preferred_element_type=jnp.float32)                 # (H, TQ, TP)
    if mask_tail:
        # padded keys (patch index >= num_patches) must not contribute
        key_idx = jax.lax.broadcasted_iota(jnp.int32, (1, 1, block_p), 2) \
            + pi * block_p
        s = jnp.where(key_idx < num_patches, s, -1e30)

    m_new = jnp.maximum(m_sc[...], jnp.max(s, axis=-1, keepdims=True))
    alpha = jnp.exp(m_sc[...] - m_new)
    p = jnp.exp(s - m_new)
    l_sc[...] = alpha * l_sc[...] + jnp.sum(p, axis=-1, keepdims=True)
    acc_sc[...] = alpha * acc_sc[...] + jnp.einsum(
        "hqk,hkd->hqd", p.astype(jnp.bfloat16), vh,
        preferred_element_type=jnp.float32)
    m_sc[...] = m_new

    # ---- finalize: folded (out_proj @ linear), ln_ffn, FFN ----
    @pl.when(pi == pl.num_programs(2) - 1)
    def _finalize():
        ctx = acc_sc[...] / l_sc[...]              # exact divide (no approx recip)
        tq = ctx.shape[1]
        ctx2 = jnp.transpose(ctx, (1, 0, 2)).reshape(tq, embed_dim)
        ctx2 = ctx2.astype(jnp.bfloat16)
        attn = jnp.dot(ctx2, w_ol_ref[...],
                       preferred_element_type=jnp.float32) + b_ol_ref[...]
        h_in = _layernorm(attn, ln_f_g_ref[...], ln_f_b_ref[...]).astype(jnp.bfloat16)
        h_mid = _gelu_new(jnp.dot(h_in, w_ffn_in_ref[...],
                                  preferred_element_type=jnp.float32))
        out = jnp.dot(h_mid.astype(jnp.bfloat16), w_ffn_out_ref[...],
                      preferred_element_type=jnp.float32)
        out_ref[0] = out.astype(out_ref.dtype)


# --------------------------------------------------------------------------- #
# one-time weight preparation (cache this across forward calls)
# --------------------------------------------------------------------------- #
def prepare_aria_weights(params, num_heads):
    """Fold consecutive linear maps / biases once; returns kernel-ready arrays."""
    f32 = jnp.float32
    E = params["query"].shape[1]
    assert E % num_heads == 0
    hd = E // num_heads
    scale = 1.0 / math.sqrt(hd)
    max_query = params["query"].shape[0]

    # query path (batch invariant): LN -> q_proj -> in_proj_q, softmax scale folded in
    q = _layernorm(params["query"].astype(f32),
                   params["ln_q_g"].astype(f32), params["ln_q_b"].astype(f32))
    w_q_eff = params["w_q"].astype(f32) @ params["w_iq"].astype(f32)
    q = (q @ w_q_eff + params["b_iq"].astype(f32)) * scale             # (maxQ, E)
    q_heads = jnp.transpose(q.reshape(max_query, num_heads, hd),
                            (1, 0, 2)).astype(jnp.bfloat16)            # (H, maxQ, hd)

    # streamed K/V path: fold k_proj->in_proj_k, v_proj->in_proj_v; drop b_ik
    # (softmax shift-invariant); defer b_iv to the output (softmax weights sum to 1).
    w_k_eff = params["w_k"].astype(f32) @ params["w_ik"].astype(f32)   # (KV, E)
    w_v_eff = params["w_v"].astype(f32) @ params["w_iv"].astype(f32)   # (KV, E)
    w_kv = jnp.concatenate([w_k_eff, w_v_eff], axis=1).astype(jnp.bfloat16)

    # fold MHA out_proj @ CrossAttention.linear (+ deferred b_iv); dropout p=0,
    # add_residual=False, so this composition is exact.
    w_attn_o = params["w_attn_o"].astype(f32)
    w_lin = params["w_lin"].astype(f32)
    b_o_eff = params["b_iv"].astype(f32) @ w_attn_o + params["b_attn_o"].astype(f32)
    w_ol = (w_attn_o @ w_lin).astype(jnp.bfloat16)                     # (E, E)
    b_ol = (b_o_eff @ w_lin + params["b_lin"].astype(f32)).astype(f32)  # (1, E)

    return {
        "q_heads": q_heads,
        "ln_kv_g": params["ln_kv_g"].astype(f32),
        "ln_kv_b": params["ln_kv_b"].astype(f32),
        "w_kv": w_kv,
        "w_ol": w_ol, "b_ol": b_ol,
        "ln_f_g": params["ln_f_g"].astype(f32),
        "ln_f_b": params["ln_f_b"].astype(f32),
        "w_ffn_in": params["w_ffn_in"].astype(jnp.bfloat16),
        "w_ffn_out": params["w_ffn_out"].astype(jnp.bfloat16),
    }


# --------------------------------------------------------------------------- #
# forward wrapper
# --------------------------------------------------------------------------- #
def aria_projector_forward(x, prepared, patch_to_query_dict, num_heads,
                           block_p=None, block_q=None, out_dtype=jnp.float32):
    bs, P, KV = x.shape
    Q = patch_to_query_dict.get(P, None)
    assert Q is not None, f"Query number for {P} patches is not provided"

    q_heads_full = prepared["q_heads"]
    H, max_q, hd = q_heads_full.shape
    assert H == num_heads and Q <= max_q
    q_heads = q_heads_full[:, :Q, :]                                  # (H, Q, hd)
    E = H * hd
    OUT = prepared["w_ffn_out"].shape[1]

    kind = _device_kind()
    if block_p is None:
        block_p = _default_block_p(P, kind)
    if block_q is None:
        # n_q = 1: the dominant ln_kv + K/V projection over P is done once.
        # (On v7x with bs == 1, pass block_q = Q // 2 to feed both TensorCores.)
        block_q = Q
    assert block_p % 8 == 0
    assert Q % block_q == 0 and (block_q == Q or block_q % 8 == 0)
    n_q = Q // block_q
    n_p = -(-P // block_p)
    P_pad = n_p * block_p
    mask_tail = P_pad != P
    if mask_tail:
        # zero-pad the patch axis; padded keys are masked to -1e30 in-kernel
        # (layernorm of a zero row is finite, its softmax weight underflows to 0).
        x = jnp.pad(x, ((0, 0), (0, P_pad - P), (0, 0)))

    weight_inputs = [
        prepared["ln_kv_g"], prepared["ln_kv_b"],
        prepared["w_kv"],
        prepared["w_ol"], prepared["b_ol"],
        prepared["ln_f_g"], prepared["ln_f_b"],
        prepared["w_ffn_in"], prepared["w_ffn_out"],
    ]

    # x chunk / q tile / output tile are pipelined; weights live whole in VMEM.
    vmem_full = pl.BlockSpec(memory_space=pltpu.MemorySpace.VMEM)
    in_specs = [
        pl.BlockSpec((1, block_p, KV), lambda b, qi, pi: (b, pi, 0)),       # x chunk
        pl.BlockSpec((H, block_q, hd), lambda b, qi, pi: (0, qi, 0)),       # q tile
    ] + [vmem_full] * len(weight_inputs)

    # VMEM budget: residents + double-buffered pipelined tiles + scratch +
    # per-chunk temporaries (scores, K/V projection), 1.5x headroom, capped
    # below the physical VMEM of the detected chip generation.
    def _nbytes(a):
        return a.size * a.dtype.itemsize
    out_itemsize = jnp.dtype(out_dtype).itemsize
    resident = sum(_nbytes(w) for w in weight_inputs)
    pipelined = (2 * block_p * KV * x.dtype.itemsize        # x chunk
                 + 2 * H * block_q * hd * 2                 # q tile (bf16)
                 + 2 * block_q * OUT * out_itemsize)        # output tile
    scratch = H * block_q * (hd + 2) * 4                    # m, l, acc
    temporaries = (block_p * KV * 2                         # x_norm bf16
                   + block_p * 2 * E * 4                    # fused K|V proj f32
                   + 2 * block_p * E * 2                    # kh, vh bf16
                   + 2 * H * block_q * block_p * 4)         # s, p f32
    estimate = resident + pipelined + scratch + temporaries
    cap = int(0.85 * _vmem_capacity_bytes(kind))
    vmem_limit = int(min(cap, max(int(1.5 * estimate), 32 * 1024 * 1024)))

    return pl.pallas_call(
        functools.partial(_aria_projector_kernel,
                          num_heads=H, embed_dim=E, num_patches=P,
                          block_p=block_p, mask_tail=mask_tail),
        out_shape=jax.ShapeDtypeStruct((bs, Q, OUT), out_dtype),
        grid=(bs, n_q, n_p),
        in_specs=in_specs,
        out_specs=pl.BlockSpec((1, block_q, OUT), lambda b, qi, pi: (b, qi, 0)),
        scratch_shapes=[
            pltpu.VMEM((H, block_q, 1), jnp.float32),     # running max
            pltpu.VMEM((H, block_q, 1), jnp.float32),     # running denom
            pltpu.VMEM((H, block_q, hd), jnp.float32),    # ctx accumulator
        ],
        compiler_params=pltpu.CompilerParams(
            dimension_semantics=("parallel", "parallel", "arbitrary"),
            vmem_limit_bytes=vmem_limit),
    )(x, q_heads, *weight_inputs)


# --------------------------------------------------------------------------- #
# parameter init + pure-JAX reference (mirrors the PyTorch forward exactly)
# --------------------------------------------------------------------------- #
def init_params(key, max_query, embed_dim, kv_dim, ff_dim, output_dim):
    ks = jax.random.split(key, 22)

    def w(k, shape, std=0.1):
        return jax.random.normal(k, shape, jnp.float32) * std

    return {
        "query":    w(ks[0], (max_query, embed_dim)),
        "ln_q_g":   1.0 + w(ks[1], (1, embed_dim), 0.02),
        "ln_q_b":   w(ks[2], (1, embed_dim), 0.05),
        "w_q":      w(ks[3], (embed_dim, embed_dim)),
        "ln_kv_g":  1.0 + w(ks[4], (1, kv_dim), 0.02),
        "ln_kv_b":  w(ks[5], (1, kv_dim), 0.05),
        "w_k":      w(ks[6], (kv_dim, embed_dim)),
        "w_v":      w(ks[7], (kv_dim, embed_dim)),
        "w_iq":     w(ks[8], (embed_dim, embed_dim)),
        "w_ik":     w(ks[9], (embed_dim, embed_dim)),
        "w_iv":     w(ks[10], (embed_dim, embed_dim)),
        "b_iq":     w(ks[11], (1, embed_dim)),
        "b_ik":     w(ks[12], (1, embed_dim)),
        "b_iv":     w(ks[13], (1, embed_dim)),
        "w_attn_o": w(ks[14], (embed_dim, embed_dim)),
        "b_attn_o": w(ks[15], (1, embed_dim)),
        "w_lin":    w(ks[16], (embed_dim, embed_dim)),
        "b_lin":    w(ks[17], (1, embed_dim)),
        "ln_f_g":   1.0 + w(ks[18], (1, embed_dim), 0.02),
        "ln_f_b":   w(ks[19], (1, embed_dim), 0.05),
        "w_ffn_in":  w(ks[20], (embed_dim, ff_dim)),
        "w_ffn_out": w(ks[21], (ff_dim, output_dim)),
    }


def reference_forward(x, params, Q, num_heads):
    def ln(v, g, b, eps=1e-5):
        mu = v.mean(-1, keepdims=True)
        var = ((v - mu) ** 2).mean(-1, keepdims=True)
        return (v - mu) / jnp.sqrt(var + eps) * g + b

    bs = x.shape[0]
    E = params["query"].shape[1]
    hd = E // num_heads
    queries = jnp.broadcast_to(params["query"][:Q], (bs, Q, E))

    q = ln(queries, params["ln_q_g"], params["ln_q_b"]) @ params["w_q"]
    xn = ln(x, params["ln_kv_g"], params["ln_kv_b"])
    k = xn @ params["w_k"]
    v = xn @ params["w_v"]
    q = q @ params["w_iq"] + params["b_iq"]
    k = k @ params["w_ik"] + params["b_ik"]
    v = v @ params["w_iv"] + params["b_iv"]

    qh = q.reshape(bs, Q, num_heads, hd).transpose(0, 2, 1, 3)
    kh = k.reshape(bs, -1, num_heads, hd).transpose(0, 2, 1, 3)
    vh = v.reshape(bs, -1, num_heads, hd).transpose(0, 2, 1, 3)
    s = jnp.einsum("bhqd,bhkd->bhqk", qh, kh) / math.sqrt(hd)
    p = jax.nn.softmax(s, axis=-1)
    ctx = jnp.einsum("bhqk,bhkd->bhqd", p, vh).transpose(0, 2, 1, 3)
    ctx = ctx.reshape(bs, Q, E)

    attn = ctx @ params["w_attn_o"] + params["b_attn_o"]
    attn = attn @ params["w_lin"] + params["b_lin"]

    h = ln(attn, params["ln_f_g"], params["ln_f_b"]) @ params["w_ffn_in"]
    h = 0.5 * h * (1.0 + jnp.tanh(math.sqrt(2.0 / math.pi)
                                  * (h + 0.044715 * h ** 3)))
    return h @ params["w_ffn_out"]


if __name__ == "__main__":
    key = jax.random.PRNGKey(0)
    # P=20 is deliberately NOT a multiple of the P-chunk so the streaming +
    # padded-key masking path (the real-Aria 1225/4900 case) is exercised.
    bs, P, KV = 2, 20, 32          # batch, num_patches, kv_dim
    E, H, FF, OUT = 32, 4, 64, 32  # embed_dim, num_heads, ff_dim, output_dim
    patch_to_query_dict = {20: 8, 64: 16}

    k_x, k_p = jax.random.split(key)
    # Make x / params exactly bf16-representable so the kernel's boundary casts
    # are lossless and the f32 reference is an apples-to-apples comparison.
    q16 = lambda a: a.astype(jnp.bfloat16).astype(jnp.float32)
    x = q16(jax.random.normal(k_x, (bs, P, KV), jnp.float32))
    params = {k: q16(v) for k, v in
              init_params(k_p, max(patch_to_query_dict.values()),
                          E, KV, FF, OUT).items()}

    # One-time weight folds (cacheable across forward calls).
    prepared = prepare_aria_weights(params, H)

    Q = patch_to_query_dict[P]
    ref = reference_forward(x, params, Q, H)

    # Streamed path: block_p=8 -> 3 K/V chunks, last one half-padded/masked.
    out = aria_projector_forward(x, prepared, patch_to_query_dict, H, block_p=8)
    out = jax.block_until_ready(out)
    assert out.shape == (bs, Q, OUT), out.shape
    err = float(jnp.max(jnp.abs(out - ref)))
    assert jnp.allclose(out, ref, atol=3e-2, rtol=3e-2), err

    # Default tiling path (single padded chunk) for extra coverage.
    out2 = jax.block_until_ready(
        aria_projector_forward(x, prepared, patch_to_query_dict, H))
    err2 = float(jnp.max(jnp.abs(out2 - ref)))
    assert jnp.allclose(out2, ref, atol=3e-2, rtol=3e-2), err2

    print("KERNEL_OK")
</pallas_src>

<mosaic_0001>
module attributes {stable_mosaic.version = 11 : i64} {
  func.func @_aria_projector_kernel(%arg0: i32, %arg1: i32, %arg2: i32, %arg3: memref<1x8x32xf32, #tpu.memory_space<vmem>>, %arg4: memref<4x8x8xbf16, #tpu.memory_space<vmem>>, %arg5: memref<1x32xf32, #tpu.memory_space<vmem>>, %arg6: memref<1x32xf32, #tpu.memory_space<vmem>>, %arg7: memref<32x64xbf16, #tpu.memory_space<vmem>>, %arg8: memref<32x32xbf16, #tpu.memory_space<vmem>>, %arg9: memref<1x32xf32, #tpu.memory_space<vmem>>, %arg10: memref<1x32xf32, #tpu.memory_space<vmem>>, %arg11: memref<1x32xf32, #tpu.memory_space<vmem>>, %arg12: memref<32x64xbf16, #tpu.memory_space<vmem>>, %arg13: memref<64x32xbf16, #tpu.memory_space<vmem>>, %arg14: memref<1x8x32xf32, #tpu.memory_space<vmem>>, %arg15: memref<4x8x1xf32, #tpu.memory_space<vmem>>, %arg16: memref<4x8x1xf32, #tpu.memory_space<vmem>>, %arg17: memref<4x8x8xf32, #tpu.memory_space<vmem>>) attributes {dimension_semantics = [#tpu.dimension_semantics<parallel>, #tpu.dimension_semantics<parallel>, #tpu.dimension_semantics<arbitrary>], iteration_bounds = array<i64: 2, 1, 3>, scalar_prefetch = 0 : i64, scratch_operands = 3 : i64, tpu.core_type = #tpu.core_type<tc>, window_params = [{transform_indices = @transform_0, window_bounds = array<i64: 1, 8, 32>}, {transform_indices = @transform_1, window_bounds = array<i64: 4, 8, 8>}, {pipeline_mode = #tpu.pipeline_mode<synchronous>, transform_indices = @transform_2, window_bounds = array<i64: 1, 32>}, {pipeline_mode = #tpu.pipeline_mode<synchronous>, transform_indices = @transform_3, window_bounds = array<i64: 1, 32>}, {pipeline_mode = #tpu.pipeline_mode<synchronous>, transform_indices = @transform_4, window_bounds = array<i64: 32, 64>}, {pipeline_mode = #tpu.pipeline_mode<synchronous>, transform_indices = @transform_5, window_bounds = array<i64: 32, 32>}, {pipeline_mode = #tpu.pipeline_mode<synchronous>, transform_indices = @transform_6, window_bounds = array<i64: 1, 32>}, {pipeline_mode = #tpu.pipeline_mode<synchronous>, transform_indices = @transform_7, window_bounds = array<i64: 1, 32>}, {pipeline_mode = #tpu.pipeline_mode<synchronous>, transform_indices = @transform_8, window_bounds = array<i64: 1, 32>}, {pipeline_mode = #tpu.pipeline_mode<synchronous>, transform_indices = @transform_9, window_bounds = array<i64: 32, 64>}, {pipeline_mode = #tpu.pipeline_mode<synchronous>, transform_indices = @transform_10, window_bounds = array<i64: 64, 32>}, {transform_indices = @transform_11, window_bounds = array<i64: 1, 8, 32>}]} {
    %c0_i32 = arith.constant 0 : i32
    %0 = arith.cmpi eq, %arg2, %c0_i32 : i32
    %1 = arith.extui %0 : i1 to i32
    %c0_i32_0 = arith.constant 0 : i32
    %2 = arith.cmpi ne, %1, %c0_i32_0 : i32
    scf.if %2 {
      %cst_44 = arith.constant 0xFF800000 : f32
      %79 = vector.broadcast %cst_44 : f32 to vector<4x8x1xf32>
      %c0_45 = arith.constant 0 : index
      %c0_46 = arith.constant 0 : index
      %c0_47 = arith.constant 0 : index
      %80 = vector.load %arg15[%c0_45, %c0_46, %c0_47] : memref<4x8x1xf32, #tpu.memory_space<vmem>>, vector<4x8x1xf32>
      tpu.vector_store %arg15[%c0_45, %c0_46, %c0_47], %79 {strides = array<i32>} : memref<4x8x1xf32, #tpu.memory_space<vmem>>, vector<4x8x1xf32>,
      %cst_48 = arith.constant 0.000000e+00 : f32
      %81 = vector.broadcast %cst_48 : f32 to vector<4x8x1xf32>
      %c0_49 = arith.constant 0 : index
      %c0_50 = arith.constant 0 : index
      %c0_51 = arith.constant 0 : index
      %82 = vector.load %arg16[%c0_49, %c0_50, %c0_51] : memref<4x8x1xf32, #tpu.memory_space<vmem>>, vector<4x8x1xf32>
      tpu.vector_store %arg16[%c0_49, %c0_50, %c0_51], %81 {strides = array<i32>} : memref<4x8x1xf32, #tpu.memory_space<vmem>>, vector<4x8x1xf32>,
      %cst_52 = arith.constant 0.000000e+00 : f32
      %83 = vector.broadcast %cst_52 : f32 to vector<4x8x8xf32>
      %c0_53 = arith.constant 0 : index
      %c0_54 = arith.constant 0 : index
      %c0_55 = arith.constant 0 : index
      %84 = vector.load %arg17[%c0_53, %c0_54, %c0_55] : memref<4x8x8xf32, #tpu.memory_space<vmem>>, vector<4x8x8xf32>
      tpu.vector_store %arg17[%c0_53, %c0_54, %c0_55], %83 {strides = array<i32>} : memref<4x8x8xf32, #tpu.memory_space<vmem>>, vector<4x8x8xf32>,
    } else {
    }
    %c0 = arith.constant 0 : index
    %c0_1 = arith.constant 0 : index
    %c0_2 = arith.constant 0 : index
    %3 = vector.load %arg3[%c0, %c0_1, %c0_2] : memref<1x8x32xf32, #tpu.memory_space<vmem>>, vector<1x8x32xf32>
    %4 = vector.shape_cast %3 : vector<1x8x32xf32> to vector<8x32xf32>
    %c0_3 = arith.constant 0 : index
    %c0_4 = arith.constant 0 : index
    %5 = vector.load %arg5[%c0_3, %c0_4] : memref<1x32xf32, #tpu.memory_space<vmem>>, vector<1x32xf32>
    %c0_5 = arith.constant 0 : index
    %c0_6 = arith.constant 0 : index
    %6 = vector.load %arg6[%c0_5, %c0_6] : memref<1x32xf32, #tpu.memory_space<vmem>>, vector<1x32xf32>
    %cst = arith.constant dense<0.000000e+00> : vector<8xf32>
    %7 = vector.multi_reduction <add>, %4, %cst [1] : vector<8x32xf32> to vector<8xf32>
    %8 = vector.shape_cast %7 : vector<8xf32> to vector<8x1xf32>
    %cst_7 = arith.constant 3.200000e+01 : f32
    %9 = vector.broadcast %cst_7 : f32 to vector<8x1xf32>
    %10 = arith.divf %8, %9 : vector<8x1xf32>
    %11 = vector.broadcast %10 : vector<8x1xf32> to vector<8x32xf32>
    %12 = arith.subf %4, %11 : vector<8x32xf32>
    %13 = arith.mulf %12, %12 : vector<8x32xf32>
    %cst_8 = arith.constant dense<0.000000e+00> : vector<8xf32>
    %14 = vector.multi_reduction <add>, %13, %cst_8 [1] : vector<8x32xf32> to vector<8xf32>
    %15 = vector.shape_cast %14 : vector<8xf32> to vector<8x1xf32>
    %cst_9 = arith.constant 3.200000e+01 : f32
    %16 = vector.broadcast %cst_9 : f32 to vector<8x1xf32>
    %17 = arith.divf %15, %16 : vector<8x1xf32>
    %18 = vector.broadcast %10 : vector<8x1xf32> to vector<8x32xf32>
    %19 = arith.subf %4, %18 : vector<8x32xf32>
    %cst_10 = arith.constant 9.99999974E-6 : f32
    %20 = vector.broadcast %cst_10 : f32 to vector<8x1xf32>
    %21 = arith.addf %17, %20 : vector<8x1xf32>
    %22 = math.rsqrt %21 : vector<8x1xf32>
    %23 = vector.broadcast %22 : vector<8x1xf32> to vector<8x32xf32>
    %24 = arith.mulf %19, %23 : vector<8x32xf32>
    %25 = vector.broadcast %5 : vector<1x32xf32> to vector<8x32xf32>
    %26 = arith.mulf %24, %25 : vector<8x32xf32>
    %27 = vector.broadcast %6 : vector<1x32xf32> to vector<8x32xf32>
    %28 = arith.addf %26, %27 : vector<8x32xf32>
    %29 = arith.truncf %28 : vector<8x32xf32> to vector<8x32xbf16>
    %c0_11 = arith.constant 0 : index
    %c0_12 = arith.constant 0 : index
    %30 = vector.load %arg7[%c0_11, %c0_12] : memref<32x64xbf16, #tpu.memory_space<vmem>>, vector<32x64xbf16>
    %cst_13 = arith.constant dense<0.000000e+00> : vector<8x64xf32>
    %31 = tpu.matmul %29, %30, %cst_13 {dimension_numbers = #tpu.dot_dimension_numbers<[1], [0], [0], [1], [0, 0, 1, 1], [], []>} : vector<8x32xbf16>, vector<32x64xbf16>, vector<8x64xf32> -> vector<8x64xf32>
    %32 = vector.extract_strided_slice %31 {offsets = [0, 0], sizes = [8, 32], strides = [1, 1]} : vector<8x64xf32> to vector<8x32xf32>
    %33 = vector.extract_strided_slice %31 {offsets = [0, 32], sizes = [8, 32], strides = [1, 1]} : vector<8x64xf32> to vector<8x32xf32>
    %34 = vector.shape_cast %32 : vector<8x32xf32> to vector<8x4x8xf32>
    %35 = tpu.transpose %34, [1, 0, 2] : vector<8x4x8xf32> -> vector<4x8x8xf32>
    %36 = arith.truncf %35 : vector<4x8x8xf32> to vector<4x8x8xbf16>
    %37 = vector.shape_cast %33 : vector<8x32xf32> to vector<8x4x8xf32>
    %38 = tpu.transpose %37, [1, 0, 2] : vector<8x4x8xf32> -> vector<4x8x8xf32>
    %39 = arith.truncf %38 : vector<4x8x8xf32> to vector<4x8x8xbf16>
    %c0_14 = arith.constant 0 : index
    %c0_15 = arith.constant 0 : index
    %c0_16 = arith.constant 0 : index
    %40 = vector.load %arg4[%c0_14, %c0_15, %c0_16] : memref<4x8x8xbf16, #tpu.memory_space<vmem>>, vector<4x8x8xbf16>
    "tpu.trace_start"() <{level = 10 : i32, message = "hqd,hkd->hqk"}> : () -> ()
    %cst_17 = arith.constant dense<0.000000e+00> : vector<4x8x8xf32>
    %41 = tpu.matmul %40, %36, %cst_17 {dimension_numbers = #tpu.dot_dimension_numbers<[2], [2], [1], [1], [0, 0, 0, 1, 1, 1], [0], [0]>} : vector<4x8x8xbf16>, vector<4x8x8xbf16>, vector<4x8x8xf32> -> vector<4x8x8xf32>
    "tpu.trace_stop"() : () -> ()
    %42 = tpu.iota {dimensions = array<i32: 2>} : vector<1x1x8xi32>
    %c8_i32 = arith.constant 8 : i32
    %43 = arith.muli %arg2, %c8_i32 : i32
    %44 = vector.broadcast %43 : i32 to vector<1x1x8xi32>
    %45 = arith.addi %42, %44 : vector<1x1x8xi32>
    %c20_i32 = arith.constant 20 : i32
    %46 = vector.broadcast %c20_i32 : i32 to vector<1x1x8xi32>
    %47 = arith.cmpi slt, %45, %46 : vector<1x1x8xi32>
    %cst_18 = arith.constant -1.000000e+30 : f32
    %48 = vector.shape_cast %47 : vector<1x1x8xi1> to vector<1x1x8xi1>
    %49 = vector.broadcast %48 : vector<1x1x8xi1> to vector<4x8x8xi1>
    %50 = vector.broadcast %cst_18 : f32 to vector<4x8x8xf32>
    %51 = arith.select %49, %41, %50 : vector<4x8x8xi1>, vector<4x8x8xf32>
    %c0_19 = arith.constant 0 : index
    %c0_20 = arith.constant 0 : index
    %c0_21 = arith.constant 0 : index
    %52 = vector.load %arg15[%c0_19, %c0_20, %c0_21] : memref<4x8x1xf32, #tpu.memory_space<vmem>>, vector<4x8x1xf32>
    %cst_22 = arith.constant dense<0xFF800000> : vector<4x8xf32>
    %53 = vector.multi_reduction <maximumf>, %51, %cst_22 [2] : vector<4x8x8xf32> to vector<4x8xf32>
    %54 = vector.shape_cast %53 : vector<4x8xf32> to vector<4x8x1xf32>
    %55 = arith.maximumf %52, %54 : vector<4x8x1xf32>
    %c0_23 = arith.constant 0 : index
    %c0_24 = arith.constant 0 : index
    %c0_25 = arith.constant 0 : index
    %56 = vector.load %arg15[%c0_23, %c0_24, %c0_25] : memref<4x8x1xf32, #tpu.memory_space<vmem>>, vector<4x8x1xf32>
    %57 = arith.subf %56, %55 : vector<4x8x1xf32>
    %58 = math.exp %57 : vector<4x8x1xf32>
    %59 = vector.broadcast %55 : vector<4x8x1xf32> to vector<4x8x8xf32>
    %60 = arith.subf %51, %59 : vector<4x8x8xf32>
    %61 = math.exp %60 : vector<4x8x8xf32>
    %c0_26 = arith.constant 0 : index
    %c0_27 = arith.constant 0 : index
    %c0_28 = arith.constant 0 : index
    %62 = vector.load %arg16[%c0_26, %c0_27, %c0_28] : memref<4x8x1xf32, #tpu.memory_space<vmem>>, vector<4x8x1xf32>
    %63 = arith.mulf %58, %62 : vector<4x8x1xf32>
    %cst_29 = arith.constant dense<0.000000e+00> : vector<4x8xf32>
    %64 = vector.multi_reduction <add>, %61, %cst_29 [2] : vector<4x8x8xf32> to vector<4x8xf32>
    %65 = vector.shape_cast %64 : vector<4x8xf32> to vector<4x8x1xf32>
    %66 = arith.addf %63, %65 : vector<4x8x1xf32>
    %c0_30 = arith.constant 0 : index
    %c0_31 = arith.constant 0 : index
    %c0_32 = arith.constant 0 : index
    %67 = vector.load %arg16[%c0_30, %c0_31, %c0_32] : memref<4x8x1xf32, #tpu.memory_space<vmem>>, vector<4x8x1xf32>
    tpu.vector_store %arg16[%c0_30, %c0_31, %c0_32], %66 {strides = array<i32>} : memref<4x8x1xf32, #tpu.memory_space<vmem>>, vector<4x8x1xf32>,
    %c0_33 = arith.constant 0 : index
    %c0_34 = arith.constant 0 : index
    %c0_35 = arith.constant 0 : index
    %68 = vector.load %arg17[%c0_33, %c0_34, %c0_35] : memref<4x8x8xf32, #tpu.memory_space<vmem>>, vector<4x8x8xf32>
    %69 = vector.broadcast %58 : vector<4x8x1xf32> to vector<4x8x8xf32>
    %70 = arith.mulf %69, %68 : vector<4x8x8xf32>
    %71 = arith.truncf %61 : vector<4x8x8xf32> to vector<4x8x8xbf16>
    "tpu.trace_start"() <{level = 10 : i32, message = "hqk,hkd->hqd"}> : () -> ()
    %cst_36 = arith.constant dense<0.000000e+00> : vector<4x8x8xf32>
    %72 = tpu.matmul %71, %39, %cst_36 {dimension_numbers = #tpu.dot_dimension_numbers<[2], [1], [1], [2], [0, 0, 0, 1, 1, 2], [0], [0]>} : vector<4x8x8xbf16>, vector<4x8x8xbf16>, vector<4x8x8xf32> -> vector<4x8x8xf32>
    "tpu.trace_stop"() : () -> ()
    %73 = arith.addf %70, %72 : vector<4x8x8xf32>
    %c0_37 = arith.constant 0 : index
    %c0_38 = arith.constant 0 : index
    %c0_39 = arith.constant 0 : index
    %74 = vector.load %arg17[%c0_37, %c0_38, %c0_39] : memref<4x8x8xf32, #tpu.memory_space<vmem>>, vector<4x8x8xf32>
    tpu.vector_store %arg17[%c0_37, %c0_38, %c0_39], %73 {strides = array<i32>} : memref<4x8x8xf32, #tpu.memory_space<vmem>>, vector<4x8x8xf32>,
    %c0_40 = arith.constant 0 : index
    %c0_41 = arith.constant 0 : index
    %c0_42 = arith.constant 0 : index
    %75 = vector.load %arg15[%c0_40, %c0_41, %c0_42] : memref<4x8x1xf32, #tpu.memory_space<vmem>>, vector<4x8x1xf32>
    tpu.vector_store %arg15[%c0_40, %c0_41, %c0_42], %55 {strides = array<i32>} : memref<4x8x1xf32, #tpu.memory_space<vmem>>, vector<4x8x1xf32>,
    %c2_i32 = arith.constant 2 : i32
    %76 = arith.cmpi eq, %arg2, %c2_i32 : i32
    %77 = arith.extui %76 : i1 to i32
    %c0_i32_43 = arith.constant 0 : i32
    %78 = arith.cmpi ne, %77, %c0_i32_43 : i32
    scf.if %78 {
      %c0_44 = arith.constant 0 : index
      %c0_45 = arith.constant 0 : index
      %c0_46 = arith.constant 0 : index
      %79 = vector.load %arg17[%c0_44, %c0_45, %c0_46] : memref<4x8x8xf32, #tpu.memory_space<vmem>>, vector<4x8x8xf32>
      %c0_47 = arith.constant 0 : index
      %c0_48 = arith.constant 0 : index
      %c0_49 = arith.constant 0 : index
      %80 = vector.load %arg16[%c0_47, %c0_48, %c0_49] : memref<4x8x1xf32, #tpu.memory_space<vmem>>, vector<4x8x1xf32>
      %81 = vector.broadcast %80 : vector<4x8x1xf32> to vector<4x8x8xf32>
      %82 = arith.divf %79, %81 : vector<4x8x8xf32>
      %83 = tpu.transpose %82, [1, 0, 2] : vector<4x8x8xf32> -> vector<8x4x8xf32>
      %84 = vector.shape_cast %83 : vector<8x4x8xf32> to vector<8x32xf32>
      %85 = arith.truncf %84 : vector<8x32xf32> to vector<8x32xbf16>
      %c0_50 = arith.constant 0 : index
      %c0_51 = arith.constant 0 : index
      %86 = vector.load %arg8[%c0_50, %c0_51] : memref<32x32xbf16, #tpu.memory_space<vmem>>, vector<32x32xbf16>
      %cst_52 = arith.constant dense<0.000000e+00> : vector<8x32xf32>
      %87 = tpu.matmul %85, %86, %cst_52 {dimension_numbers = #tpu.dot_dimension_numbers<[1], [0], [0], [1], [0, 0, 1, 1], [], []>} : vector<8x32xbf16>, vector<32x32xbf16>, vector<8x32xf32> -> vector<8x32xf32>
      %c0_53 = arith.constant 0 : index
      %c0_54 = arith.constant 0 : index
      %88 = vector.load %arg9[%c0_53, %c0_54] : memref<1x32xf32, #tpu.memory_space<vmem>>, vector<1x32xf32>
      %89 = vector.broadcast %88 : vector<1x32xf32> to vector<8x32xf32>
      %90 = arith.addf %87, %89 : vector<8x32xf32>
      %c0_55 = arith.constant 0 : index
      %c0_56 = arith.constant 0 : index
      %91 = vector.load %arg10[%c0_55, %c0_56] : memref<1x32xf32, #tpu.memory_space<vmem>>, vector<1x32xf32>
      %c0_57 = arith.constant 0 : index
      %c0_58 = arith.constant 0 : index
      %92 = vector.load %arg11[%c0_57, %c0_58] : memref<1x32xf32, #tpu.memory_space<vmem>>, vector<1x32xf32>
      %cst_59 = arith.constant dense<0.000000e+00> : vector<8xf32>
      %93 = vector.multi_reduction <add>, %90, %cst_59 [1] : vector<8x32xf32> to vector<8xf32>
      %94 = vector.shape_cast %93 : vector<8xf32> to vector<8x1xf32>
      %cst_60 = arith.constant 3.200000e+01 : f32
      %95 = vector.broadcast %cst_60 : f32 to vector<8x1xf32>
      %96 = arith.divf %94, %95 : vector<8x1xf32>
      %97 = vector.broadcast %96 : vector<8x1xf32> to vector<8x32xf32>
      %98 = arith.subf %90, %97 : vector<8x32xf32>
      %99 = arith.mulf %98, %98 : vector<8x32xf32>
      %cst_61 = arith.constant dense<0.000000e+00> : vector<8xf32>
      %100 = vector.multi_reduction <add>, %99, %cst_61 [1] : vector<8x32xf32> to vector<8xf32>
      %101 = vector.shape_cast %100 : vector<8xf32> to vector<8x1xf32>
      %cst_62 = arith.constant 3.200000e+01 : f32
      %102 = vector.broadcast %cst_62 : f32 to vector<8x1xf32>
      %103 = arith.divf %101, %102 : vector<8x1xf32>
      %104 = vector.broadcast %96 : vector<8x1xf32> to vector<8x32xf32>
      %105 = arith.subf %90, %104 : vector<8x32xf32>
      %cst_63 = arith.constant 9.99999974E-6 : f32
      %106 = vector.broadcast %cst_63 : f32 to vector<8x1xf32>
      %107 = arith.addf %103, %106 : vector<8x1xf32>
      %108 = math.rsqrt %107 : vector<8x1xf32>
      %109 = vector.broadcast %108 : vector<8x1xf32> to vector<8x32xf32>
      %110 = arith.mulf %105, %109 : vector<8x32xf32>
      %111 = vector.broadcast %91 : vector<1x32xf32> to vector<8x32xf32>
      %112 = arith.mulf %110, %111 : vector<8x32xf32>
      %113 = vector.broadcast %92 : vector<1x32xf32> to vector<8x32xf32>
      %114 = arith.addf %112, %113 : vector<8x32xf32>
      %115 = arith.truncf %114 : vector<8x32xf32> to vector<8x32xbf16>
      %c0_64 = arith.constant 0 : index
      %c0_65 = arith.constant 0 : index
      %116 = vector.load %arg12[%c0_64, %c0_65] : memref<32x64xbf16, #tpu.memory_space<vmem>>, vector<32x64xbf16>
      %cst_66 = arith.constant dense<0.000000e+00> : vector<8x64xf32>
      %117 = tpu.matmul %115, %116, %cst_66 {dimension_numbers = #tpu.dot_dimension_numbers<[1], [0], [0], [1], [0, 0, 1, 1], [], []>} : vector<8x32xbf16>, vector<32x64xbf16>, vector<8x64xf32> -> vector<8x64xf32>
      %cst_67 = arith.constant 5.000000e-01 : f32
      %118 = vector.broadcast %cst_67 : f32 to vector<8x64xf32>
      %119 = arith.mulf %118, %117 : vector<8x64xf32>
      %cst_68 = arith.constant 4.471500e-02 : f32
      %120 = vector.broadcast %cst_68 : f32 to vector<8x64xf32>
      %121 = arith.mulf %120, %117 : vector<8x64xf32>
      %122 = arith.mulf %121, %117 : vector<8x64xf32>
      %123 = arith.mulf %122, %117 : vector<8x64xf32>
      %124 = arith.addf %117, %123 : vector<8x64xf32>
      %cst_69 = arith.constant 0.797884583 : f32
      %125 = vector.broadcast %cst_69 : f32 to vector<8x64xf32>
      %126 = arith.mulf %125, %124 : vector<8x64xf32>
      %127 = math.tanh %126 : vector<8x64xf32>
      %cst_70 = arith.constant 1.000000e+00 : f32
      %128 = vector.broadcast %cst_70 : f32 to vector<8x64xf32>
      %129 = arith.addf %128, %127 : vector<8x64xf32>
      %130 = arith.mulf %119, %129 : vector<8x64xf32>
      %131 = arith.truncf %130 : vector<8x64xf32> to vector<8x64xbf16>
      %c0_71 = arith.constant 0 : index
      %c0_72 = arith.constant 0 : index
      %132 = vector.load %arg13[%c0_71, %c0_72] : memref<64x32xbf16, #tpu.memory_space<vmem>>, vector<64x32xbf16>
      %cst_73 = arith.constant dense<0.000000e+00> : vector<8x32xf32>
      %133 = tpu.matmul %131, %132, %cst_73 {dimension_numbers = #tpu.dot_dimension_numbers<[1], [0], [0], [1], [0, 0, 1, 1], [], []>} : vector<8x64xbf16>, vector<64x32xbf16>, vector<8x32xf32> -> vector<8x32xf32>
      %c0_74 = arith.constant 0 : index
      %c0_75 = arith.constant 0 : index
      %c0_76 = arith.constant 0 : index
      %134 = vector.load %arg14[%c0_74, %c0_75, %c0_76] : memref<1x8x32xf32, #tpu.memory_space<vmem>>, vector<1x8x32xf32>
      %135 = vector.shape_cast %134 : vector<1x8x32xf32> to vector<8x32xf32>
      %136 = vector.shape_cast %133 : vector<8x32xf32> to vector<1x8x32xf32>
      tpu.vector_store %arg14[%c0_74, %c0_75, %c0_76], %136 {strides = array<i32>} : memref<1x8x32xf32, #tpu.memory_space<vmem>>, vector<1x8x32xf32>,
    } else {
    }
    return
  }
  func.func @transform_0(%arg0: i32, %arg1: i32, %arg2: i32) -> (i32, i32, i32) {
    %c0_i32 = arith.constant 0 : i32
    %c0_i32_0 = arith.constant 0 : i32
    return %arg0, %arg2, %c0_i32 : i32, i32, i32
  }
  func.func @transform_1(%arg0: i32, %arg1: i32, %arg2: i32) -> (i32, i32, i32) {
    %c0_i32 = arith.constant 0 : i32
    %c0_i32_0 = arith.constant 0 : i32
    %c0_i32_1 = arith.constant 0 : i32
    return %c0_i32, %arg1, %c0_i32_0 : i32, i32, i32
  }
  func.func @transform_2(%arg0: i32, %arg1: i32, %arg2: i32) -> (i32, i32) {
    %c0_i32 = arith.constant 0 : i32
    %c0_i32_0 = arith.constant 0 : i32
    %c0_i32_1 = arith.constant 0 : i32
    return %c0_i32, %c0_i32_0 : i32, i32
  }
  func.func @transform_3(%arg0: i32, %arg1: i32, %arg2: i32) -> (i32, i32) {
    %c0_i32 = arith.constant 0 : i32
    %c0_i32_0 = arith.constant 0 : i32
    %c0_i32_1 = arith.constant 0 : i32
    return %c0_i32, %c0_i32_0 : i32, i32
  }
  func.func @transform_4(%arg0: i32, %arg1: i32, %arg2: i32) -> (i32, i32) {
    %c0_i32 = arith.constant 0 : i32
    %c0_i32_0 = arith.constant 0 : i32
    %c0_i32_1 = arith.constant 0 : i32
    return %c0_i32, %c0_i32_0 : i32, i32
  }
  func.func @transform_5(%arg0: i32, %arg1: i32, %arg2: i32) -> (i32, i32) {
    %c0_i32 = arith.constant 0 : i32
    %c0_i32_0 = arith.constant 0 : i32
    %c0_i32_1 = arith.constant 0 : i32
    return %c0_i32, %c0_i32_0 : i32, i32
  }
  func.func @transform_6(%arg0: i32, %arg1: i32, %arg2: i32) -> (i32, i32) {
    %c0_i32 = arith.constant 0 : i32
    %c0_i32_0 = arith.constant 0 : i32
    %c0_i32_1 = arith.constant 0 : i32
    return %c0_i32, %c0_i32_0 : i32, i32
  }
  func.func @transform_7(%arg0: i32, %arg1: i32, %arg2: i32) -> (i32, i32) {
    %c0_i32 = arith.constant 0 : i32
    %c0_i32_0 = arith.constant 0 : i32
    %c0_i32_1 = arith.constant 0 : i32
    return %c0_i32, %c0_i32_0 : i32, i32
  }
  func.func @transform_8(%arg0: i32, %arg1: i32, %arg2: i32) -> (i32, i32) {
    %c0_i32 = arith.constant 0 : i32
    %c0_i32_0 = arith.constant 0 : i32
    %c0_i32_1 = arith.constant 0 : i32
    return %c0_i32, %c0_i32_0 : i32, i32
  }
  func.func @transform_9(%arg0: i32, %arg1: i32, %arg2: i32) -> (i32, i32) {
    %c0_i32 = arith.constant 0 : i32
    %c0_i32_0 = arith.constant 0 : i32
    %c0_i32_1 = arith.constant 0 : i32
    return %c0_i32, %c0_i32_0 : i32, i32
  }
  func.func @transform_10(%arg0: i32, %arg1: i32, %arg2: i32) -> (i32, i32) {
    %c0_i32 = arith.constant 0 : i32
    %c0_i32_0 = arith.constant 0 : i32
    %c0_i32_1 = arith.constant 0 : i32
    return %c0_i32, %c0_i32_0 : i32, i32
  }
  func.func @transform_11(%arg0: i32, %arg1: i32, %arg2: i32) -> (i32, i32, i32) {
    %c0_i32 = arith.constant 0 : i32
    %c0_i32_0 = arith.constant 0 : i32
    return %arg0, %arg1, %c0_i32 : i32, i32, i32
  }
}

</mosaic_0001>

<bundles_post_ra>
// kernel: tpu_custom_call.1
= control target key start
LH: loop header
LB: loop body
LE: loop exit
PB: predicated region body
PF: predicated region fallthrough
CT: control target
= control target key end

     0   :  { %s3305_s0 = inlined_call_operand.vmem [shape: f32[2,24,32], index: 0, kind: input, shape index: {}]   ;;  %s3306_s1 = inlined_call_operand.hbm [shape: bf16[4,8,8], index: 1, kind: input, shape index: {}]   ;;  %s3307_s2 = inlined_call_operand.vmem [shape: f32[1,32], index: 2, kind: input, shape index: {}]   ;;  %s3308_s3 = inlined_call_operand.vmem [shape: f32[1,32], index: 3, kind: input, shape index: {}]   ;;  %s3309_s4 = inlined_call_operand.hbm [shape: bf16[32,64], index: 4, kind: input, shape index: {}]   ;;  %s3310_s5 = inlined_call_operand.hbm [shape: bf16[32,32], index: 5, kind: input, shape index: {}]   ;;  %s3311_s6 = inlined_call_operand.hbm [shape: f32[1,32], index: 6, kind: input, shape index: {}]   ;;  %s3312_s7 = inlined_call_operand.hbm [shape: f32[1,32], index: 7, kind: input, shape index: {}]   ;;  %s3313_s8 = inlined_call_operand.hbm [shape: f32[1,32], index: 8, kind: input, shape index: {}]   ;;  %s3314_s9 = inlined_call_operand.vmem [shape: bf16[32,64], index: 9, kind: input, shape index: {}]   ;;  %s3315_s10 = inlined_call_operand.vmem [shape: bf16[64,32], index: 10, kind: input, shape index: {}]   ;;  %s3316_s11 = inlined_call_operand.hbm [shape: f32[2,8,32], index: 11, kind: output, shape index: {}]  }
   0x1   :  { %3336 = sst [smem:[#allocation32_spill]] %s3306_s1 }
   0x2   :  { %3337 = sst [smem:[#allocation33_spill]] %s3309_s4 }
   0x3   :  { %3338 = sst [smem:[#allocation34_spill]] %s3316_s11 }
   0x4   :  { %16 = vsyncpa [#allocation6], 0 }
   0x5   :  { %17 = vsyncpa [#allocation9], 0 }
   0x6   :  { %18 = vsyncpa [#allocation12], 0 }
   0x7   :  { %19 = vsyncpa [#allocation15], 0 }
   0x8   :  { %20 = vsyncpa [#allocation7], 0 }
   0x9   :  { %22 = vsyncpa [#allocation7 + $0x1], 0  ;;  %s2770_s17 = smov 0   ;;  %s2772_s18 = smov 0  }
   0xa   :  { %s2774_s19 = smov 0   ;;  %s2776_s20 = smov 0  }
   0xb   :  { %s2778_s21 = smov 0   ;;  %s2780_s22 = smov 0  }
   0xc   :  { %s2782_s23 = smov 0   ;;  %s2784_s24 = smov 0  }
   0xd LB: > { %3339 = sst [smem:[#allocation22_spill]] %s2654_s17  ;;  %s2035_s25 = sadd.s32 4294967295, %s2682_s24   ;;  %s2682_s24 = sphi %s2784_s24, %s28_s24   ;;  %s2678_s23 = sphi %s2782_s23, %s3373_s23   ;;  %s2674_s22 = sphi %s2780_s22, %s3372_s22   ;;  %s2670_s21 = sphi %s2778_s21, %s3371_s21   ;;  %s2666_s20 = sphi %s2776_s20, %s3370_s20   ;;  %s2662_s19 = sphi %s2774_s19, %s3369_s19   ;;  %s2658_s18 = sphi %s2772_s18, %s3375_s18   ;;  %s2654_s17 = sphi %s2770_s17, %s3374_s17  }
   0xe   : > { %3340 = sst [smem:[#allocation23_spill]] %s2662_s19  ;;  %s2036_s26 = sadd.s32 4294967294, %s2682_s24  }
   0xf   : > { %3341 = sst [smem:[#allocation24_spill]] %s2674_s22  ;;  %s40_s27 = sadd.s32 1, %s2674_s22 }
  0x10   : > { %3342 = sst [smem:[#allocation25_spill]] %s2678_s23  ;;  %s47_s28 = sadd.s32 1, %s2678_s23 }
  0x11   : > { %3343 = sst [smem:[#allocation26_spill]] %s2682_s24  ;;  %p41_p0 = scmp.ge.s32.totalorder %s40_s27, 3 }
  0x12   : > { %s299_s29 = sadd.s32 1, %s2662_s19  ;;  %p309_p1 = scmp.ne.s32.totalorder %s2662_s19, %s2658_s18 }
  0x13   : > { %p310_p2 = scmp.eq.s32.totalorder %s2035_s25, 5  ;;  %s3377_s27 = smov (%p41_p0, %s40_s27), 0 }
  0x14   : > { %3344 = sst [smem:[#allocation27_spill]] %s3377_s27  ;;  %s3379_s28 = smov (!%p41_p0, %s47_s28), %s2678_s23 }
  0x15   : > { %p2820_p3 = por %p310_p2, %p309_p1  ;;  %p315_p4 = scmp.ne.s32.totalorder %s2658_s18, %s2654_s17 }
  0x16   : > { %p49_p5 = scmp.ge.s32.totalorder %s3379_s28, 2  ;;  %p316_p6 = scmp.eq.s32.totalorder %s2036_s26, 5 }
  0x17   : > { %s3345_s30 = scalar_select %p2820_p3, 1, 0 }
  0x18   : > { %p2037_p7 = scmp.ge.s32.totalorder %s2682_s24, 1  ;;  %p323_p8 = scmp.lt.s32.totalorder %s2682_s24, 7 }
  0x19   : > { %3346 = sst [smem:[#allocation28_spill]] %s3345_s30  ;;  %s3381_s28 = smov (%p49_p5, %s3379_s28), 0 }
  0x1a   : > { %3347 = sst [smem:[#allocation29_spill]] %s3381_s28  ;;  %p2830_p9 = por %p316_p6, %p315_p4 }
  0x1b   : > { %p2834_p10 = pnand %p2037_p7, %p323_p8  ;;  %s294_s14 = ssub.s32 %s2678_s23, %s3381_s28 }
  0x1c   : > { %s3348_s12 = scalar_select %p2830_p9, 1, 0 }
  0x1d   : > { %s3350_s13 = scalar_select %p2834_p10, 1, 0 }
  0x1e   : > { %3349 = sst [smem:[#allocation30_spill]] %s3348_s12  ;;  %p297_p11 = scmp.eq.s32.totalorder %s294_s14, 0 }
  0x1f   : > { %p2235_p12 = pneg %p2834_p10  ;;  %p2842_p13 = scmp.eq.s32.totalorder %s2035_s25, 0 }
  0x20   : > { %s2847_s16 = scalar_select %p297_p11, %s2662_s19, %s299_s29  }
  0x21   : > { %s3351_s15 = scalar_select %p2842_p13, 1, 0 }
  0x22   : > { %3352 = sst [smem:[#allocation31_spill]] %s2847_s16  ;;  %p2851_p0 = pnand %p2842_p13, %p2235_p12 }
  0x23   : > { %s2684_s27 = smov [#allocation8]   ;;  %s2685_s28 = smov [#allocation11]  }
  0x24   : > { %s356_s22 = sshll.u32 %s2684_s27, 4  ;;  %s383_s14 = sshll.u32 %s2685_s28, 4  ;;  %s357_s22 = int_to_ptr.vmem [resolvable:$true] %s356_s22  ;;  %s384_s14 = int_to_ptr.vmem [resolvable:$true] %s383_s14 }
  0x25   : > { %s3354_s4 = sld [smem:[#allocation33_spill]]  ;;  %p2863_p2 = pneg %p2851_p0 }
  0x2b   : > { %s2404_s25 = scalar_lea.hbm %s3354_s4, 256 }
  0x2c   : > { %p2405_p1 = scmp.ne.s32.totalorder %s3354_s4, %s2404_s25  ;;  %p2411_p6 = scmp.lt.u32.totalorder %s2404_s25, %s3354_s4 }
  0x2e   : > { %p2407_p4 = pnand %p2863_p2, %p2405_p1 }
  0x30   : > { %p2408_p5 = pneg %p2407_p4 }
  0x32   : > { %p2413_p7 = pnand %p2411_p6, %p2408_p5 }
  0x34   : > { %2416 = shalt.err (!%p2413_p7)
}
  0x35   : > { %s2417_s23 = scalar_lea.vmem %s357_s22, 256  ;;  %p2425_p9 = scmp.lt.s32.totalorder %s357_s22, %s357_s22 }
  0x36   : > { %p2418_p8 = scmp.ne.s32.totalorder %s357_s22, %s2417_s23  ;;  %p2426_p3 = scmp.lt.s32.totalorder %s2417_s23, %s2417_s23 }
  0x38   : > { %p2420_p11 = pnand %p2418_p8, %p2863_p2  ;;  %p2427_p13 = por %p2426_p3, %p2425_p9 }
  0x3a   : > { %p2421_p12 = pneg %p2420_p11 }
  0x3c   : > { %p2428_p10 = pnand %p2427_p13, %p2421_p12 }
  0x3e   : > { %2431 = shalt.err (!%p2428_p10)
}
  0x3f   : > { %s3332_s17 = smov 64   ;;  %s3334_s24 = smov 4  }
  0x40   : > { %2241 = dma.hbm_to_vmem [thread:$0]  (!%p2851_p0), %s3354_s4, 256, %s357_s22, [#allocation9], %s3332_s17, %s3332_s17, %s3334_s24  }
  0x41   : > { %s2432_s27 = scalar_lea.hbm %s3311_s6, 16 }
  0x42   : > { %p2433_p3 = scmp.ne.s32.totalorder %s3311_s6, %s2432_s27  ;;  %p2439_p13 = scmp.lt.u32.totalorder %s2432_s27, %s3311_s6 }
  0x44   : > { %p2435_p9 = pnand %p2433_p3, %p2863_p2 }
  0x46   : > { %p2436_p10 = pneg %p2435_p9 }
  0x48   : > { %p2441_p1 = pnand %p2439_p13, %p2436_p10 }
  0x4a   : > { %2444 = shalt.err (!%p2441_p1)
}
  0x4b   : > { %s2445_s28 = scalar_lea.vmem %s384_s14, 16  ;;  %s2452_s22 = scalar_lea.vmem %s384_s14, 32 }
  0x4c   : > { %p2446_p4 = scmp.ne.s32.totalorder %s384_s14, %s2445_s28  ;;  %p2453_p7 = scmp.lt.s32.totalorder %s384_s14, %s384_s14 }
  0x4d   : > { %p2454_p8 = scmp.lt.s32.totalorder %s2452_s22, %s2445_s28 }
  0x4e   : > { %p2448_p5 = pnand %p2446_p4, %p2863_p2 }
  0x4f   : > { %p2455_p11 = por %p2454_p8, %p2453_p7 }
  0x50   : > { %p2449_p6 = pneg %p2448_p5 }
  0x52   : > { %p2456_p12 = pnand %p2455_p11, %p2449_p6 }
  0x54   : > { %2459 = shalt.err (!%p2456_p12)
}
  0x55   : > { %2247 = dma.hbm_to_vmem [thread:$0]  (!%p2851_p0), %s3311_s6, 16, %s384_s14, [#allocation12]  }
  0x56   : > { %s2688_s11 = smov [#allocation5]   ;;  %s2689_s16 = smov [#allocation10]  }
  0x57   : > { %s337_s30 = sshll.u32 %s2688_s11, 4  ;;  %s369_s25 = sshll.u32 %s2689_s16, 4  ;;  %s338_s30 = int_to_ptr.vmem [resolvable:$true] %s337_s30  ;;  %s370_s25 = int_to_ptr.vmem [resolvable:$true] %s369_s25 }
  0x58   : > { %s3356_s1 = sld [smem:[#allocation32_spill]] }
  0x5e   : > { %s2460_s17 = scalar_lea.hbm %s3356_s1, 256 }
  0x5f   : > { %p2461_p3 = scmp.ne.s32.totalorder %s3356_s1, %s2460_s17  ;;  %p2467_p13 = scmp.lt.u32.totalorder %s2460_s17, %s3356_s1 }
  0x61   : > { %p2463_p9 = pnand %p2461_p3, %p2863_p2 }
  0x63   : > { %p2464_p10 = pneg %p2463_p9 }
  0x65   : > { %p2469_p1 = pnand %p2467_p13, %p2464_p10 }
  0x67   : > { %2472 = shalt.err (!%p2469_p1)
}
  0x68   : > { %s2473_s14 = scalar_lea.vmem %s338_s30, 256  ;;  %p2481_p7 = scmp.lt.s32.totalorder %s338_s30, %s338_s30 }
  0x69   : > { %p2474_p4 = scmp.ne.s32.totalorder %s338_s30, %s2473_s14  ;;  %p2482_p8 = scmp.lt.s32.totalorder %s2473_s14, %s2473_s14 }
  0x6b   : > { %p2476_p5 = pnand %p2474_p4, %p2863_p2  ;;  %p2483_p11 = por %p2482_p8, %p2481_p7 }
  0x6d   : > { %p2477_p6 = pneg %p2476_p5 }
  0x6f   : > { %p2484_p12 = pnand %p2483_p11, %p2477_p6 }
  0x71   : > { %2487 = shalt.err (!%p2484_p12)
}
  0x72   : > { %s3357_s12 = smov 4   ;;  %s3358_s11 = smov 64  }
  0x73   : > { %2238 = dma.hbm_to_vmem [thread:$0]  (!%p2851_p0), %s3356_s1, 256, %s338_s30, [#allocation6], %s3358_s11, %s3358_s11, %s3357_s12  }
  0x74   : > { %s2488_s23 = scalar_lea.hbm %s3310_s5, 256 }
  0x75   : > { %p2489_p3 = scmp.ne.s32.totalorder %s3310_s5, %s2488_s23  ;;  %p2495_p13 = scmp.lt.u32.totalorder %s2488_s23, %s3310_s5 }
  0x77   : > { %p2491_p9 = pnand %p2489_p3, %p2863_p2 }
  0x79   : > { %p2492_p10 = pneg %p2491_p9 }
  0x7b   : > { %p2497_p1 = pnand %p2495_p13, %p2492_p10 }
  0x7d   : > { %2500 = shalt.err (!%p2497_p1)
}
  0x7e   : > { %s2501_s24 = scalar_lea.vmem %s370_s25, 256  ;;  %p2509_p7 = scmp.lt.s32.totalorder %s370_s25, %s370_s25 }
  0x7f   : > { %p2502_p4 = scmp.ne.s32.totalorder %s370_s25, %s2501_s24  ;;  %p2510_p8 = scmp.lt.s32.totalorder %s2501_s24, %s2501_s24 }
  0x81   : > { %p2504_p5 = pnand %p2502_p4, %p2863_p2  ;;  %p2511_p11 = por %p2510_p8, %p2509_p7 }
  0x83   : > { %p2505_p6 = pneg %p2504_p5 }
  0x85   : > { %p2512_p12 = pnand %p2511_p11, %p2505_p6 }
  0x87   : > { %2515 = shalt.err (!%p2512_p12)
}
  0x88   : > { %2244 = dma.hbm_to_vmem [thread:$0]  (!%p2851_p0), %s3310_s5, 256, %s370_s25, [#allocation9], %s3358_s11, %s3358_s11, %s3357_s12  }
  0x89   : > { %s2690_s16 = smov [#allocation13]   ;;  %s2691_s23 = smov [#allocation14]  }
  0x8a   : > { %s394_s27 = sshll.u32 %s2690_s16, 4  ;;  %s405_s28 = sshll.u32 %s2691_s23, 4  ;;  %s395_s27 = int_to_ptr.vmem [resolvable:$true] %s394_s27  ;;  %s406_s28 = int_to_ptr.vmem [resolvable:$true] %s405_s28 }
  0x8b   : > { %s2516_s14 = scalar_lea.hbm %s3312_s7, 16 }
  0x8c   : > { %p2517_p3 = scmp.ne.s32.totalorder %s3312_s7, %s2516_s14  ;;  %p2523_p13 = scmp.lt.u32.totalorder %s2516_s14, %s3312_s7 }
  0x8e   : > { %p2519_p9 = pnand %p2517_p3, %p2863_p2 }
  0x90   : > { %p2520_p10 = pneg %p2519_p9 }
  0x92   : > { %p2525_p1 = pnand %p2523_p13, %p2520_p10 }
  0x94   : > { %2528 = shalt.err (!%p2525_p1)
}
  0x95   : > { %s2529_s25 = scalar_lea.vmem %s395_s27, 16  ;;  %s2536_s12 = scalar_lea.vmem %s395_s27, 32 }
  0x96   : > { %p2530_p4 = scmp.ne.s32.totalorder %s395_s27, %s2529_s25  ;;  %p2537_p7 = scmp.lt.s32.totalorder %s395_s27, %s395_s27 }
  0x97   : > { %p2538_p8 = scmp.lt.s32.totalorder %s2536_s12, %s2529_s25 }
  0x98   : > { %p2532_p5 = pnand %p2530_p4, %p2863_p2 }
  0x99   : > { %p2539_p11 = por %p2538_p8, %p2537_p7 }
  0x9a   : > { %p2533_p6 = pneg %p2532_p5 }
  0x9c   : > { %p2540_p12 = pnand %p2539_p11, %p2533_p6 }
  0x9e   : > { %2543 = shalt.err (!%p2540_p12)
}
  0x9f   : > { %2250 = dma.hbm_to_vmem [thread:$0]  (!%p2851_p0), %s3312_s7, 16, %s395_s27, [#allocation12]  }
  0xa0   : > { %s2544_s16 = scalar_lea.hbm %s3313_s8, 16 }
  0xa1   : > { %p2545_p3 = scmp.ne.s32.totalorder %s3313_s8, %s2544_s16  ;;  %p2551_p13 = scmp.lt.u32.totalorder %s2544_s16, %s3313_s8 }
  0xa3   : > { %p2547_p9 = pnand %p2545_p3, %p2863_p2 }
  0xa5   : > { %p2548_p10 = pneg %p2547_p9 }
  0xa7   : > { %p2553_p1 = pnand %p2551_p13, %p2548_p10 }
  0xa9   : > { %2556 = shalt.err (!%p2553_p1)
}
  0xaa   : > { %s2557_s24 = scalar_lea.vmem %s406_s28, 16  ;;  %s2564_s27 = scalar_lea.vmem %s406_s28, 32 }
  0xab   : > { %p2558_p4 = scmp.ne.s32.totalorder %s406_s28, %s2557_s24  ;;  %p2565_p7 = scmp.lt.s32.totalorder %s406_s28, %s406_s28 }
  0xac   : > { %p2566_p8 = scmp.lt.s32.totalorder %s2564_s27, %s2557_s24 }
  0xad   : > { %p2560_p5 = pnand %p2558_p4, %p2863_p2 }
  0xae   : > { %p2567_p11 = por %p2566_p8, %p2565_p7 }
  0xaf   : > { %p2561_p6 = pneg %p2560_p5 }
  0xb1   : > { %p2568_p12 = pnand %p2567_p11, %p2561_p6 }
  0xb3   : > { %2571 = shalt.err (!%p2568_p12)
}
  0xb4   : > { %2253 = dma.hbm_to_vmem [thread:$0]  (!%p2851_p0), %s3313_s8, 16, %s406_s28, [#allocation15]  }
  0xb5   : > { %p3359_p3 = scmp.ne.s32.totalorder %s3350_s13, 0 }
  0xb6   : > { %p3360_p9 = scmp.ne.s32.totalorder (!%p3359_p3), %s3351_s15, 0 }
  0xb7   : > { %435 = sbr.rel (%p3359_p3) target bundleno = 2844 (0xb1c), region = 64 }
  0xbe   : > { %2633 = dma.done.wait (%p3360_p9), [#allocation6], 256  }
  0xbf   : > { %2635 = vsyncadd (%p3360_p9), [#allocation6], 4294967040 }
  0xc0   : > { %2637 = dma.done.wait (%p3360_p9), [#allocation9], 512  }
  0xc1   : > { %2639 = vsyncadd (%p3360_p9), [#allocation9], 4294966784 }
  0xc2   : > { %2641 = dma.done.wait (%p3360_p9), [#allocation12], 32  }
  0xc3   : > { %2643 = vsyncadd (%p3360_p9), [#allocation12], 4294967264 }
  0xc4   : > { %2645 = dma.done.wait (%p3360_p9), [#allocation15], 16  }
  0xc5   : > { %2647 = vsyncadd (%p3360_p9), [#allocation15], 4294967280  ;;  %s495_s13 = sand.u32 1, %s2658_s18   ;;  %p498_p0 = scmp.lt.s32.totalorder %s2670_s21, 1 }
  0xc6   : > { %s3000_s26 = sshll.u32 %s495_s13, 3  ;;  %p500_p2 = scmp.lt.s32.totalorder %s2666_s20, 2 }
  0xc7   : > { %s499_s29 = scalar_select %p498_p0, %s2670_s21, 1 }
  0xc8   : > { %s501_s28 = scalar_select %p500_p2, %s2666_s20, 2 }
  0xc9   : > { %s2208_s12 = smul.u32 3, %s499_s29  ;;  %s497_s16 = scalar_lea.vmem [#allocation16], %s3000_s26 }
  0xca   : > { %p2054_p10 = scmp.ne.s32.totalorder %s2666_s20, 0 }
  0xcb   : > { %s503_s1 = sadd.s32 %s2208_s12, %s501_s28  ;;  %vm511_vm0 = vcmask (!%p2054_p10), 7168   ;;  %vm520_vm1 = vcmask (!%p2054_p10), 64512   ;;  %v2692_v0 = vmov (!%p2054_p10), -inf   ;;  %v2693_v1 = vmov (!%p2054_p10), 0.0  }
  0xcc   : > { %s2053_s11 = sshll.u32 %s503_s1, 3  ;;  %510 = sbr.rel (%p2054_p10) target bundleno = 211 (0xd3), region = 92  ;;  %512 = vst.msk [vmem:[#allocation2] sm:$0xff] (!%p2054_p10), %vm511_vm0, %v2692_v0  ;;  %513 = vst.msk [vmem:[#allocation2 + $0x8] sm:$0xff] (!%p2054_p10), %vm511_vm0, %v2692_v0 }
  0xcd   : > { %s505_s17 = scalar_lea.vmem %s3305_s0, %s2053_s11  ;;  %514 = vst.msk [vmem:[#allocation2 + $0x10] sm:$0xff] (!%p2054_p10), %vm511_vm0, %v2692_v0  ;;  %515 = vst.msk [vmem:[#allocation2 + $0x18] sm:$0xff] (!%p2054_p10), %vm511_vm0, %v2692_v0 }
  0xce   : > { %516 = vst.msk [vmem:[#allocation3] sm:$0xff] (!%p2054_p10), %vm511_vm0, %v2693_v1  ;;  %517 = vst.msk [vmem:[#allocation3 + $0x8] sm:$0xff] (!%p2054_p10), %vm511_vm0, %v2693_v1 }
  0xcf   : > { %518 = vst.msk [vmem:[#allocation3 + $0x10] sm:$0xff] (!%p2054_p10), %vm511_vm0, %v2693_v1  ;;  %519 = vst.msk [vmem:[#allocation3 + $0x18] sm:$0xff] (!%p2054_p10), %vm511_vm0, %v2693_v1 }
  0xd0   : > { %521 = vst.msk [vmem:[#allocation4] sm:$0xff] (!%p2054_p10), %vm520_vm1, %v2693_v1  ;;  %522 = vst.msk [vmem:[#allocation4 + $0x8] sm:$0xff] (!%p2054_p10), %vm520_vm1, %v2693_v1 }
  0xd1   : > { %523 = vst.msk [vmem:[#allocation4 + $0x10] sm:$0xff] (!%p2054_p10), %vm520_vm1, %v2693_v1  ;;  %524 = vst.msk [vmem:[#allocation4 + $0x18] sm:$0xff] (!%p2054_p10), %vm520_vm1, %v2693_v1 }
  0xd3 PF: > { %v525_v2 = vld [vmem:[%s505_s17] sm:$0xff]  ;;  %vm528_vm2 = vcmask 261120   ;;  %v2362_v9 = vld [vmem:[#allocation8] sm:$0xff]   ;;  %v2694_v10 = vmov 0.0   ;;  %vm2695_vm3 = vmmov 0   ;;  %v2363_v11 = vld [vmem:[#allocation8 + $0x8] sm:$0xff]   ;;  %v632_v28 = vlaneseq }
  0xd4   : > { %v529_v3 = vsel %vm528_vm2, %v525_v2, 0.0  ;;  %2124 = vmatprep.subr.bf16.mxu0 %v2694_v10  ;;  %2128 = vmatprep.mubr.msk.bf16.mxu0 %vm2695_vm3, %v2694_v10  ;;  %v2055_v16 = vld [vmem:[%s3307_s2] ss:$0 sm:$0xff]  ;;  %s2696_s24 = smov 104   ;;  %s2697_s27 = smov 120   ;;  %vm923_vm4 = vcmask 64512  }
  0xd5   : > { %530 = vadd.xlane.f32.xlu0 %v529_v3  ;;  %2125 = vmatpush3.bf16.msra.mxu0 %v2362_v9  ;;  %v2056_v18 = vld [vmem:[%s3308_s3] ss:$0 sm:$0xff]  ;;  %s2698_s30 = smov 112   ;;  %v2699_v26 = vmov 1983009808   ;;  %v633_v32 = vshrl.u32 %v632_v28, 7 }
  0xd6   : > { %2132 = vmatprep.subr.bf16.mxu1 %v2694_v10  ;;  %2126 = vmatprep.subr.bf16.mxu0 %v2694_v10  ;;  %v630_v27 = vunpack.c.l.s4 %v2699_v26  ;;  %v2700_v29 = vmov 1934713408   ;;  %s2068_s25 = sshll.u32 %s2666_s20, 3  ;;  %s2702_s29 = smov 96   ;;  %vm1208_vm6 = vcmask 7168   ;;  %vm1248_vm7 = vcmask 1043456  }
  0xd7   : > { %2134 = vmatprep.mubr.msk.bf16.mxu1 %vm2695_vm3, %v2694_v10  ;;  %v662_v30 = vunpack.c.l.s4 %v2700_v29  ;;  %v1111_v26 = vstv %s2068_s25  ;;  %p2073_p13 = scmp.ne.s32.totalorder %s2666_s20, 2 }
  0xd8   : > { %v631_v31 = vunpack.c.0.s8 %v630_v27  ;;  %vm2705_vm8 = vmmov (!%p2073_p13), 0   ;;  %s2706_s20 = smov (!%p2073_p13), 16   ;;  %s2707_s28 = smov (!%p2073_p13), 8   ;;  %vm1631_vm9 = vcmask (!%p2073_p13), 130048   ;;  %vm1633_vm10 = vcmask (!%p2073_p13), 195584  }
  0xd9   : > { %2127 = vmatpush3.bf16.msra.mxu0 %v2363_v11  ;;  %v663_v35 = vunpack.c.0.s8 %v662_v30  ;;  %s2708_s12 = smov (!%p2073_p13), 24   ;;  %vm1833_vm11 = vcmask (!%p2073_p13), 523264  }
  0xda   : > { %2138 = vmatprep.subr.bf16.mxu0 %v2694_v10  ;;  %v3039_v36 = vsub.s32 %v631_v31, %v633_v32 }
  0xdb   : > { %v3051_v42 = vsub.s32 %v663_v35, %v633_v32 }
 0x162   : > { %v531_v4 = vpop.xlane.xlu0 %530 }
 0x163   : > { %v533_v5 = vmul.f32 0.03125, %v531_v4 }
 0x165   : > { %v534_v6 = vsub.f32 %v525_v2, %v533_v5 }
 0x167   : > { %v535_v7 = vmul.f32 %v534_v6, %v534_v6 }
 0x169   : > { %v536_v8 = vsel %vm528_vm2, %v535_v7, 0.0 }
 0x16a   : > { %537 = vadd.xlane.f32.xlu0 %v536_v8 }
 0x1f7   : > { %v538_v12 = vpop.xlane.xlu0 %537 }
 0x1f8   : > { %v539_v13 = vmul.f32 0.03125, %v538_v12 }
 0x1fa   : > { %v540_v14 = vadd.f32 1e-05, %v539_v13 }
 0x1fc   : > { %2364 = vrsqrt.f32 %v540_v14 }
 0x206   : > { %v2365_v15 = vpop.eup %2364 }
 0x207   : > { %v542_v17 = vmul.f32 %v2365_v15, %v534_v6 }
 0x209   : > { %v549_v19 = vmul.f32 %v2055_v16, %v542_v17 }
 0x20b   : > { %v556_v20 = vadd.f32 %v2056_v18, %v549_v19  ;;  %v919_v18 = vld [vmem:[#allocation5] sm:$0xf]  ;;  %v920_v19 = vld [vmem:[#allocation5 + $0x4] sm:$0xf] }
 0x20d   : > { %v557_v21 = vpack.c.bf16 %v556_v20, %v556_v20 }
 0x20f   : > { %2129 = vmatmul.mubr.msk.bf16.vlgmr.msra.gmra.mrb[0].mxu0 %vm528_vm2, %v557_v21 }
 0x210   : > { %2140 = vmatprep.mubr.msk.bf16.mxu0 %vm2695_vm3, %v2694_v10 }
 0x2e2   : > { %v3029_v22 = vpop.f32.mrb[0].mxu0 }
 0x2e3   : > { %624 = vrot.lane.b32.xlu0 %v3029_v22, %s2696_s24  ;;  %618 = vrot.lane.b32.xlu1 %v3029_v22, %s2697_s27  ;;  %v2130_v23 = vpop.f32.mrb[1].mxu0 }
 0x2e4   : > { %v614_v24 = vpop.f32.mrb[2].mxu0  ;;  %v921_v23 = vld [vmem:[#allocation5 + $0x8] sm:$0xf] }
 0x2e5   : > { %v2131_v25 = vpop.f32.mrb[3].mxu0  ;;  %v922_v24 = vld [vmem:[#allocation5 + $0xc] sm:$0xf] }
 0x2e6   : > { %v1109_v25 = vand.u32 127, %v632_v28 }
 0x2e7   : > { %621 = vrot.lane.b32.xlu1 %v3029_v22, %s2698_s30 }
 0x2e8   : > { %v1112_v27 = vadd.s32 %v1111_v26, %v1109_v25 }
 0x2ea   : > { %vm1113_vm5 = vcmp.lt.s32.totalorder %v1112_v27, 20 }
 0x355   : > { %v3035_v33 = vpop.permute.xlu0 %624  ;;  %v3037_v34 = vpop.permute.xlu1 %618 }
 0x356   : > { %v643_v37 = vcombine.low %v3037_v34, %v3035_v33  ;;  %v644_v38 = vcombine.high %v3037_v34, %v3035_v33 }
 0x358   : > { %v651_v43 = vrot.slane %v643_v37, %v3039_v36  ;;  %v658_v44 = vrot.slane %v644_v38, %v3039_v36 }
 0x359   : > { %v3045_v39 = vpop.permute.xlu1 %621 }
 0x35a   : > { %v627_v40 = vcombine.low %v3029_v22, %v3045_v39  ;;  %v628_v41 = vcombine.high %v3029_v22, %v3045_v39 }
 0x35c   : > { %v635_v45 = vrot.slane %v627_v40, %v3039_v36  ;;  %v642_v46 = vrot.slane %v628_v41, %v3039_v36 }
 0x35e   : > { %v659_v47 = vcombine.low %v635_v45, %v651_v43  ;;  %v660_v48 = vcombine.high %v635_v45, %v651_v43  ;;  %v675_v49 = vcombine.low %v642_v46, %v658_v44  ;;  %v676_v50 = vcombine.high %v642_v46, %v658_v44 }
 0x360   : > { %v667_v51 = vrot.slane %v659_v47, %v3051_v42  ;;  %v674_v52 = vrot.slane %v660_v48, %v3051_v42  ;;  %v683_v53 = vrot.slane %v675_v49, %v3051_v42  ;;  %v690_v54 = vrot.slane %v676_v50, %v3051_v42 }
 0x362   : > { %v695_v55 = vcombine.low %v667_v51, %v674_v52  ;;  %v2060_v56 = vcombine.high %v667_v51, %v674_v52  ;;  %v711_v57 = vcombine.low %v683_v53, %v690_v54  ;;  %v2061_v58 = vcombine.high %v683_v53, %v690_v54 }
 0x364   : > { %v702_v59 = vrot.slane %v695_v55, %v3039_v36  ;;  %v710_v60 = vrot.slane %v2060_v56, %v3039_v36  ;;  %v718_v61 = vrot.slane %v711_v57, %v3039_v36  ;;  %v726_v62 = vrot.slane %v2061_v58, %v3039_v36  ;;  %v1120_v58 = vld [vmem:[#allocation2] sm:$0xff] }
 0x365   : > { %v2701_v57 = vmov 0  }
 0x366   : > { %v727_v63 = vcombine.low %v702_v59, %v710_v60  ;;  %v743_v0 = vcombine.low %v718_v61, %v726_v62  ;;  %v728_v1 = vcombine.high %v702_v59, %v710_v60  ;;  %v744_v2 = vcombine.high %v718_v61, %v726_v62  ;;  %2360 = vset.pattern.permute.xlu1 %v2701_v57  ;;  %v1121_v59 = vld [vmem:[#allocation2 + $0x8] sm:$0xff] }
 0x367   : > { %2361 = vset.pattern.permute.xlu0 %v2701_v57 }
 0x368   : > { %v735_v3 = vrot.slane %v727_v63, %v3051_v42  ;;  %v751_v4 = vrot.slane %v743_v0, %v3051_v42  ;;  %v742_v7 = vrot.slane %v728_v1, %v3051_v42  ;;  %v758_v8 = vrot.slane %v744_v2, %v3051_v42  ;;  %v3117_v2 = vld [vmem:[#allocation2 + $0x10] sm:$0xff] }
 0x36a   : > { %v759_v5 = vcombine.low %v735_v3, %v751_v4  ;;  %v760_v6 = vcombine.high %v735_v3, %v751_v4  ;;  %v761_v14 = vcombine.low %v742_v7, %v758_v8  ;;  %v762_v15 = vcombine.high %v742_v7, %v758_v8  ;;  %v3122_v3 = vld [vmem:[#allocation2 + $0x18] sm:$0xff] }
 0x36c   : > { %v763_v9 = vpack.c.bf16 %v759_v5, %v759_v5  ;;  %v764_v11 = vpack.c.bf16 %v760_v6, %v760_v6  ;;  %v765_v16 = vpack.c.bf16 %v761_v14, %v761_v14  ;;  %v766_v17 = vpack.c.bf16 %v762_v15, %v762_v15 }
 0x36e   : > { %v928_v12 = vsel %vm923_vm4, %v763_v9, 0  ;;  %v974_v13 = vsel %vm923_vm4, %v764_v11, 0  ;;  %v1020_v20 = vsel %vm923_vm4, %v765_v16, 0  ;;  %v1066_v21 = vsel %vm923_vm4, %v766_v17, 0 }
 0x36f   : > { %2133 = vmatpush3.bf16.xpose.msra.mxu1 %v928_v12  ;;  %2139 = vmatpush3.bf16.xpose.msra.mxu0 %v974_v13 }
 0x370   : > { %2144 = vmatprep.subr.bf16.mxu1 %v2694_v10  ;;  %2150 = vmatprep.subr.bf16.mxu0 %v2694_v10 }
 0x376   : > { %2135 = vmatmul.mubr.msk.bf16.vlgmr.msra.gmra.mrb[0].mxu1 %vm923_vm4, %v919_v18  ;;  %2141 = vmatmul.mubr.msk.bf16.vlgmr.msra.gmra.mrb[4].mxu0 %vm923_vm4, %v920_v19 }
 0x377   : > { %2145 = vmatpush3.bf16.xpose.msra.mxu1 %v1020_v20  ;;  %2151 = vmatpush3.bf16.xpose.msra.mxu0 %v1066_v21 }
 0x378   : > { %2146 = vmatprep.mubr.msk.bf16.mxu1 %vm2695_vm3, %v2694_v10  ;;  %2152 = vmatprep.mubr.msk.bf16.mxu0 %vm2695_vm3, %v2694_v10 }
 0x379   : > { %2156 = vmatprep.subr.bf16.mxu1 %v2694_v10  ;;  %2162 = vmatprep.subr.bf16.mxu0 %v2694_v10 }
 0x37e   : > { %2147 = vmatmul.mubr.msk.bf16.vlgmr.msra.gmra.mrb[4].mxu1 %vm923_vm4, %v921_v23  ;;  %2153 = vmatmul.mubr.msk.bf16.vlgmr.msra.gmra.mrb[8].mxu0 %vm923_vm4, %v922_v24 }
 0x37f   : > { %2158 = vmatprep.mubr.msk.bf16.mxu1 %vm2695_vm3, %v2694_v10  ;;  %2164 = vmatprep.mubr.msk.bf16.mxu0 %vm2695_vm3, %v2694_v10 }
 0x449   : > { %v964_v29 = vpop.f32.mrb[0].mxu1  ;;  %v1010_v30 = vpop.f32.mrb[4].mxu0 }
 0x44a   : > { %v3092_v31 = vsel %vm1113_vm5, %v964_v29, -1e+30  ;;  %v3095_v32 = vsel %vm1113_vm5, %v1010_v30, -1e+30  ;;  %v2136_v35 = vpop.f32.mrb[1].mxu1  ;;  %v2142_v37 = vpop.f32.mrb[5].mxu0 }
 0x44b   : > { %v967_v38 = vpop.f32.mrb[2].mxu1  ;;  %v1124_v40 = vsel %vm923_vm4, %v3092_v31, -inf  ;;  %v1127_v28 = vsel %vm923_vm4, %v3095_v32, -inf  ;;  %v1013_v41 = vpop.f32.mrb[6].mxu0 }
 0x44c   : > { %1125 = vmax.xlane.f32.xlu1 %v1124_v40  ;;  %v2137_v43 = vpop.f32.mrb[3].mxu1  ;;  %1128 = vmax.xlane.f32.xlu0 %v1127_v28  ;;  %v2143_v44 = vpop.f32.mrb[7].mxu0 }
 0x451   : > { %v1056_v45 = vpop.f32.mrb[4].mxu1  ;;  %v1102_v46 = vpop.f32.mrb[8].mxu0 }
 0x452   : > { %v3102_v47 = vsel %vm1113_vm5, %v1056_v45, -1e+30  ;;  %v2148_v48 = vpop.f32.mrb[5].mxu1  ;;  %v3105_v49 = vsel %vm1113_vm5, %v1102_v46, -1e+30  ;;  %v2154_v50 = vpop.f32.mrb[9].mxu0 }
 0x453   : > { %v1059_v51 = vpop.f32.mrb[6].mxu1  ;;  %v1130_v52 = vsel %vm923_vm4, %v3102_v47, -inf  ;;  %v1105_v53 = vpop.f32.mrb[10].mxu0  ;;  %v1133_v56 = vsel %vm923_vm4, %v3105_v49, -inf }
 0x454   : > { %1131 = vmax.xlane.f32.xlu1 %v1130_v52  ;;  %v2149_v54 = vpop.f32.mrb[7].mxu1  ;;  %v2155_v55 = vpop.f32.mrb[11].mxu0 }
 0x458   : > { %1134 = vmax.xlane.f32.xlu1 %v1133_v56 }
 0x462   : > { %769 = vrot.lane.b32.xlu0 %v3037_v34, %s2702_s29 }
 0x469   : > { %767 = vrot.lane.b32.xlu1 %v3029_v22, %s2702_s29 }
 0x46d   : > { %771 = vrot.lane.b32.xlu1 %v3045_v39, %s2702_s29 }
 0x471   : > { %773 = vrot.lane.b32.xlu1 %v3035_v33, %s2702_s29 }
 0x4d9   : > { %v1126_v60 = vpop.xlane.xlu1 %1125  ;;  %v1129_v61 = vpop.xlane.xlu0 %1128 }
 0x4da   : > { %v1136_v62 = vmax.f32 %v1120_v58, %v1126_v60  ;;  %v1137_v63 = vmax.f32 %v1121_v59, %v1129_v61 }
 0x4dc   : > { %v1140_v0 = vsub.f32 %v1120_v58, %v1136_v62  ;;  %1438 = vst.msk [vmem:[#allocation2] sm:$0xff] %vm1208_vm6, %v1136_v62  ;;  %v1141_v1 = vsub.f32 %v1121_v59, %v1137_v63  ;;  %1439 = vst.msk [vmem:[#allocation2 + $0x8] sm:$0xff] %vm1208_vm6, %v1137_v63  ;;  %1154 = vperm.xlu1 %2360, %v1136_v62  }
 0x4dd   : > { %v770_v15 = vpop.permute.xlu0 %769 }
 0x4de   : > { %v1144_v34 = vmul.f32 1.442695, %v1140_v0  ;;  %v1146_v22 = vmul.f32 1.442695, %v1141_v1 }
 0x4e0   : > { %2366 = vpow2.f32 %v1144_v34  ;;  %1159 = vperm.xlu1 %2360, %v1137_v63  }
 0x4e1   : > { %2368 = vpow2.f32 %v1146_v22  ;;  %v1132_v33 = vpop.xlane.xlu1 %1131 }
 0x4e2   : > { %v3120_v39 = vmax.f32 %v3117_v2, %v1132_v33 }
 0x4e4   : > { %v1142_v4 = vsub.f32 %v3117_v2, %v3120_v39  ;;  %1440 = vst.msk [vmem:[#allocation2 + $0x10] sm:$0xff] %vm1208_vm6, %v3120_v39  ;;  %1164 = vperm.xlu0 %2361, %v3120_v39  }
 0x4e5   : > { %v1135_v5 = vpop.xlane.xlu1 %1134 }
 0x4e6   : > { %v3130_v6 = vmax.f32 %v3122_v3, %v1135_v5 }
 0x4e8   : > { %v1143_v7 = vsub.f32 %v3122_v3, %v3130_v6  ;;  %1441 = vst.msk [vmem:[#allocation2 + $0x18] sm:$0xff] %vm1208_vm6, %v3130_v6  ;;  %1169 = vperm.xlu1 %2360, %v3130_v6   ;;  %v1186_v3 = vld [vmem:[#allocation3 + $0x10] sm:$0xff] }
 0x4e9   : > { %v768_v8 = vpop.permute.xlu1 %767 }
 0x4ea   : > { %v3137_v9 = vpop.eup %2366 }
 0x4eb   : > { %v3139_v11 = vpop.eup %2368  ;;  %1219 = vperm.xlu0 %2361, %v3137_v9  }
 0x4ec   : > { %1224 = vperm.xlu1 %2360, %v3139_v11  }
 0x4ed   : > { %v772_v12 = vpop.permute.xlu1 %771 }
 0x4ee   : > { %v779_v13 = vcombine.low %v768_v8, %v772_v12  ;;  %v780_v14 = vcombine.high %v768_v8, %v772_v12 }
 0x4f0   : > { %v787_v19 = vrot.slane %v779_v13, %v3039_v36  ;;  %v794_v20 = vrot.slane %v780_v14, %v3039_v36 }
 0x4f1   : > { %v774_v16 = vpop.permute.xlu1 %773 }
 0x4f2   : > { %v795_v17 = vcombine.low %v770_v15, %v774_v16  ;;  %v796_v18 = vcombine.high %v770_v15, %v774_v16 }
 0x4f4   : > { %v803_v21 = vrot.slane %v795_v17, %v3039_v36  ;;  %v810_v23 = vrot.slane %v796_v18, %v3039_v36 }
 0x4f6   : > { %v811_v24 = vcombine.low %v787_v19, %v803_v21  ;;  %v812_v25 = vcombine.high %v787_v19, %v803_v21  ;;  %v827_v26 = vcombine.low %v794_v20, %v810_v23  ;;  %v828_v27 = vcombine.high %v794_v20, %v810_v23 }
 0x4f8   : > { %v819_v29 = vrot.slane %v811_v24, %v3051_v42  ;;  %v826_v30 = vrot.slane %v812_v25, %v3051_v42  ;;  %v835_v35 = vrot.slane %v827_v26, %v3051_v42  ;;  %v842_v37 = vrot.slane %v828_v27, %v3051_v42 }
 0x4fa   : > { %v847_v38 = vcombine.low %v819_v29, %v826_v30  ;;  %v2062_v40 = vcombine.high %v819_v29, %v826_v30  ;;  %v863_v28 = vcombine.low %v835_v35, %v842_v37  ;;  %v2063_v41 = vcombine.high %v835_v35, %v842_v37 }
 0x4fb   : > { %v1148_v37 = vmul.f32 1.442695, %v1142_v4 }
 0x4fc   : > { %v854_v43 = vrot.slane %v847_v38, %v3039_v36  ;;  %v862_v44 = vrot.slane %v2062_v40, %v3039_v36  ;;  %v870_v45 = vrot.slane %v863_v28, %v3039_v36  ;;  %v878_v46 = vrot.slane %v2063_v41, %v3039_v36  ;;  %v1184_v41 = vld [vmem:[#allocation3] sm:$0xff] }
 0x4fe   : > { %v879_v48 = vcombine.low %v854_v43, %v862_v44  ;;  %v895_v50 = vcombine.low %v870_v45, %v878_v46  ;;  %v880_v51 = vcombine.high %v854_v43, %v862_v44  ;;  %v896_v52 = vcombine.high %v870_v45, %v878_v46  ;;  %v1185_v46 = vld [vmem:[#allocation3 + $0x8] sm:$0xff] }
 0x4ff   : > { %v1188_v43 = vmul.f32 %v3137_v9, %v1184_v41  ;;  %v1189_v2 = vmul.f32 %v3139_v11, %v1185_v46 }
 0x500   : > { %v887_v53 = vrot.slane %v879_v48, %v3051_v42  ;;  %v903_v54 = vrot.slane %v895_v50, %v3051_v42  ;;  %v894_v55 = vrot.slane %v880_v51, %v3051_v42  ;;  %v910_v56 = vrot.slane %v896_v52, %v3051_v42  ;;  %v1187_v50 = vld [vmem:[#allocation3 + $0x18] sm:$0xff] }
 0x502   : > { %v911_v57 = vcombine.low %v887_v53, %v903_v54  ;;  %v912_v58 = vcombine.high %v887_v53, %v903_v54  ;;  %v913_v59 = vcombine.low %v894_v55, %v910_v56  ;;  %v914_v60 = vcombine.high %v894_v55, %v910_v56  ;;  %v1213_v54 = vld [vmem:[#allocation4] sm:$0xff]  ;;  %v1214_v56 = vld [vmem:[#allocation4 + $0x8] sm:$0xff] }
 0x504   : > { %v915_v61 = vpack.c.bf16 %v911_v57, %v911_v57  ;;  %v916_v62 = vpack.c.bf16 %v912_v58, %v912_v58  ;;  %v917_v63 = vpack.c.bf16 %v913_v59, %v913_v59  ;;  %v918_v0 = vpack.c.bf16 %v914_v60, %v914_v60 }
 0x506   : > { %v1250_v1 = vsel %vm1248_vm7, %v915_v61, 0  ;;  %v1296_v34 = vsel %vm1248_vm7, %v916_v62, 0  ;;  %v1342_v22 = vsel %vm1248_vm7, %v917_v63, 0  ;;  %v1388_v33 = vsel %vm1248_vm7, %v918_v0, 0  ;;  %v1215_v62 = vld [vmem:[#allocation4 + $0x10] sm:$0xff] }
 0x507   : > { %2157 = vmatpush3.bf16.msra.mxu1 %v1250_v1  ;;  %2163 = vmatpush3.bf16.msra.mxu0 %v1296_v34 }
 0x508   : > { %2168 = vmatprep.subr.bf16.mxu1 %v2694_v10  ;;  %2174 = vmatprep.subr.bf16.mxu0 %v2694_v10 }
 0x55b   : > { %v1155_v5 = vpop.permute.xlu1 %1154 }
 0x55c   : > { %v1172_v8 = vsub.f32 %v3092_v31, %v1155_v5 }
 0x55e   : > { %v1176_v12 = vmul.f32 1.442695, %v1172_v8  ;;  %v1216_v8 = vld [vmem:[#allocation4 + $0x18] sm:$0xff] }
 0x55f   : > { %v1160_v13 = vpop.permute.xlu1 %1159 }
 0x560   : > { %2370 = vpow2.f32 %v1176_v12  ;;  %v1173_v14 = vsub.f32 %v3095_v32, %v1160_v13 }
 0x562   : > { %v1178_v15 = vmul.f32 1.442695, %v1173_v14 }
 0x563   : > { %v1165_v16 = vpop.permute.xlu0 %1164 }
 0x564   : > { %2372 = vpow2.f32 %v1178_v15  ;;  %v1174_v17 = vsub.f32 %v3102_v47, %v1165_v16 }
 0x566   : > { %v1180_v18 = vmul.f32 1.442695, %v1174_v17 }
 0x567   : > { %v1170_v19 = vpop.permute.xlu1 %1169 }
 0x568   : > { %2374 = vpow2.f32 %v1180_v18  ;;  %v1175_v20 = vsub.f32 %v3105_v49, %v1170_v19 }
 0x56a   : > { %v2371_v21 = vpop.eup %2370  ;;  %v1182_v23 = vmul.f32 1.442695, %v1175_v20  ;;  %v1220_v44 = vpop.permute.xlu0 %1219 }
 0x56b   : > { %v1192_v24 = vsel %vm923_vm4, %v2371_v21, 0.0  ;;  %v1241_v31 = vpack.c.bf16 %v2371_v21, %v2371_v21  ;;  %v1225_v28 = vpop.permute.xlu1 %1224  ;;  %v1237_v55 = vmul.f32 %v1220_v44, %v1213_v54 }
 0x56c   : > { %2376 = vpow2.f32 %v1182_v23  ;;  %1193 = vadd.xlane.f32.xlu1 %v1192_v24  ;;  %v1238_v60 = vmul.f32 %v1225_v28, %v1214_v56 }
 0x56d   : > { %2159 = vmatmul.mubr.msk.bf16.vlgmr.msra.gmra.mrb[8].mxu1 %vm923_vm4, %v1241_v31  ;;  %2378 = vpow2.f32 %v1148_v37 }
 0x56e   : > { %v2373_v32 = vpop.eup %2372  ;;  %2169 = vmatpush3.bf16.msra.mxu1 %v1342_v22  ;;  %2170 = vmatprep.mubr.msk.bf16.mxu1 %vm2695_vm3, %v2694_v10 }
 0x56f   : > { %v1195_v47 = vsel %vm923_vm4, %v2373_v32, 0.0  ;;  %v1242_v25 = vpack.c.bf16 %v2373_v32, %v2373_v32 }
 0x570   : > { %1196 = vadd.xlane.f32.xlu0 %v1195_v47  ;;  %v2703_v47 = vmov (!%p2073_p13), 0  }
 0x571   : > { %2165 = vmatmul.mubr.msk.bf16.vlgmr.msra.gmra.mrb[12].mxu0 %vm923_vm4, %v1242_v25 }
 0x572   : > { %v2375_v49 = vpop.eup %2374  ;;  %2175 = vmatpush3.bf16.msra.mxu0 %v1388_v33  ;;  %2176 = vmatprep.mubr.msk.bf16.mxu0 %vm2695_vm3, %v2694_v10  ;;  %v1150_v10 = vmul.f32 1.442695, %v1143_v7 }
 0x573   : > { %v1198_v26 = vsel %vm923_vm4, %v2375_v49, 0.0  ;;  %v1243_v27 = vpack.c.bf16 %v2375_v49, %v2375_v49 }
 0x574   : > { %1199 = vadd.xlane.f32.xlu0 %v1198_v26  ;;  %2380 = vpow2.f32 %v1150_v10  ;;  %v2704_v26 = vmov (!%p2073_p13), 0.0  }
 0x575   : > { %2171 = vmatmul.mubr.msk.bf16.vlgmr.msra.gmra.mrb[12].mxu1 %vm923_vm4, %v1243_v27  ;;  %2180 = vmatprep.subr.bf16.mxu1 (!%p2073_p13), %v2704_v26 }
 0x576   : > { %v2377_v29 = vpop.eup %2376  ;;  %2196 = vmatprep.subr.bf16.mxu0 (!%p2073_p13), %v2704_v26  ;;  %2184 = vmatprep.mubr.msk.bf16.mxu1 (!%p2073_p13), %vm2705_vm8, %v2704_v26 }
 0x577   : > { %v1201_v30 = vsel %vm923_vm4, %v2377_v29, 0.0  ;;  %v1244_v35 = vpack.c.bf16 %v2377_v29, %v2377_v29  ;;  %v2379_v38 = vpop.eup %2378 }
 0x578   : > { %1202 = vadd.xlane.f32.xlu1 %v1201_v30  ;;  %v1190_v6 = vmul.f32 %v2379_v38, %v1186_v3 }
 0x579   : > { %2177 = vmatmul.mubr.msk.bf16.vlgmr.msra.gmra.mrb[16].mxu0 %vm923_vm4, %v1244_v35 }
 0x57a   : > { %2204 = vmatprep.mubr.msk.bf16.mxu0 (!%p2073_p13), %vm2705_vm8, %v2704_v26 }
 0x57e   : > { %v2381_v40 = vpop.eup %2380 }
 0x57f   : > { %v1191_v9 = vmul.f32 %v2381_v40, %v1187_v50 }
 0x589   : > { %1229 = vperm.xlu1 %2360, %v2379_v38  }
 0x58a   : > { %1234 = vperm.xlu0 %2361, %v2381_v40  }
 0x58d   : > { %2383 = vset.pattern.permute.xlu1 (!%p2073_p13), %v2703_v47 }
 0x58e   : > { %2382 = vset.pattern.permute.xlu0 (!%p2073_p13), %v2703_v47 }
 0x5f9   : > { %v1194_v45 = vpop.xlane.xlu1 %1193 }
 0x5fa   : > { %v1204_v48 = vadd.f32 %v1194_v45, %v1188_v43 }
 0x5fc   : > { %1209 = vst.msk [vmem:[#allocation3] sm:$0xff] %vm1208_vm6, %v1204_v48 }
 0x5fd   : > { %v1197_v39 = vpop.xlane.xlu0 %1196 }
 0x5fe   : > { %v1205_v4 = vadd.f32 %v1197_v39, %v1189_v2 }
 0x600   : > { %1210 = vst.msk [vmem:[#allocation3 + $0x8] sm:$0xff] %vm1208_vm6, %v1205_v4 }
 0x601   : > { %v1200_v7 = vpop.xlane.xlu0 %1199 }
 0x602   : > { %v1206_v51 = vadd.f32 %v1200_v7, %v1190_v6 }
 0x603   : > { %v1450_v32 = vld [vmem:[#allocation3] sm:$0xff] (!%p2073_p13) }
 0x604   : > { %1211 = vst.msk [vmem:[#allocation3 + $0x10] sm:$0xff] %vm1208_vm6, %v1206_v51  ;;  %1456 = vperm.xlu0 (!%p2073_p13), %2382, %v1450_v32  }
 0x605   : > { %v1203_v52 = vpop.xlane.xlu1 %1202 }
 0x606   : > { %v1207_v53 = vadd.f32 %v1203_v52, %v1191_v9  ;;  %v2384_v52 = vld [vmem:[#allocation10] sm:$0xff] (!%p2073_p13)  }
 0x607   : > { %v1451_v49 = vld [vmem:[#allocation3 + $0x8] sm:$0xff] (!%p2073_p13)  ;;  %2181 = vmatpush3.bf16.msra.mxu1 (!%p2073_p13), %v2384_v52  ;;  %v2390_v52 = vld [vmem:[%s3315_s10 + $0x10] sm:$0xff] (!%p2073_p13)  }
 0x608   : > { %1212 = vst.msk [vmem:[#allocation3 + $0x18] sm:$0xff] %vm1208_vm6, %v1207_v53  ;;  %1461 = vperm.xlu0 (!%p2073_p13), %2382, %v1451_v49   ;;  %2182 = vmatprep.subr.bf16.mxu1 (!%p2073_p13), %v2704_v26 }
 0x609   : > { %v1230_v63 = vpop.permute.xlu1 %1229  ;;  %v1235_v12 = vpop.permute.xlu0 %1234 }
 0x60a   : > { %v1239_v33 = vmul.f32 %v1230_v63, %v1215_v62  ;;  %v1240_v17 = vmul.f32 %v1235_v12, %v1216_v8 }
 0x60b   : > { %v1452_v31 = vld [vmem:[#allocation3 + $0x10] sm:$0xff] (!%p2073_p13) }
 0x60c   : > { %1466 = vperm.xlu1 (!%p2073_p13), %2383, %v1452_v31  }
 0x60f   : > { %v1453_v25 = vld [vmem:[#allocation3 + $0x18] sm:$0xff] (!%p2073_p13) }
 0x610   : > { %1471 = vperm.xlu1 (!%p2073_p13), %2383, %v1453_v25   ;;  %v2076_v25 = vld [vmem:[#allocation11] ss:$0 sm:$0xff] (!%p2073_p13) }
 0x640   : > { %v1286_v11 = vpop.f32.mrb[8].mxu1 }
 0x641   : > { %v1430_v57 = vadd.f32 %v1286_v11, %v1237_v55  ;;  %v2160_v58 = vpop.f32.mrb[9].mxu1 }
 0x642   : > { %v1289_v59 = vpop.f32.mrb[10].mxu1 }
 0x643   : > { %1434 = vst.msk [vmem:[#allocation4] sm:$0xff] %vm923_vm4, %v1430_v57  ;;  %v2161_v61 = vpop.f32.mrb[11].mxu1 }
 0x644   : > { %v1332_v0 = vpop.f32.mrb[12].mxu0 }
 0x645   : > { %v1431_v1 = vadd.f32 %v1332_v0, %v1238_v60  ;;  %v2166_v34 = vpop.f32.mrb[13].mxu0  ;;  %v2385_v60 = vld [vmem:[#allocation10 + $0x8] sm:$0xff] (!%p2073_p13)  }
 0x646   : > { %v1335_v22 = vpop.f32.mrb[14].mxu0  ;;  %2183 = vmatpush3.bf16.msra.mxu1 (!%p2073_p13), %v2385_v60 }
 0x647   : > { %1435 = vst.msk [vmem:[#allocation4 + $0x8] sm:$0xff] %vm923_vm4, %v1431_v1  ;;  %v2167_v5 = vpop.f32.mrb[15].mxu0  ;;  %2188 = vmatprep.subr.bf16.mxu1 (!%p2073_p13), %v2704_v26 }
 0x648   : > { %v1378_v13 = vpop.f32.mrb[12].mxu1 }
 0x649   : > { %v1432_v14 = vadd.f32 %v1378_v13, %v1239_v33  ;;  %v2172_v15 = vpop.f32.mrb[13].mxu1  ;;  %1445 = sbr.rel (%p2073_p13) target bundleno = 2817 (0xb01), region = 96 }
 0x64a   : > { %v1381_v16 = vpop.f32.mrb[14].mxu1  ;;  %v1446_v10 = vld [vmem:[#allocation4] sm:$0xff] (!%p2073_p13) }
 0x64b   : > { %1436 = vst.msk [vmem:[#allocation4 + $0x10] sm:$0xff] %vm923_vm4, %v1432_v14  ;;  %v2173_v18 = vpop.f32.mrb[15].mxu1 }
 0x64c   : > { %v1424_v19 = vpop.f32.mrb[16].mxu0 }
 0x64d   : > { %v1433_v20 = vadd.f32 %v1424_v19, %v1240_v17  ;;  %v2178_v21 = vpop.f32.mrb[17].mxu0 }
 0x64e   : > { %v1427_v23 = vpop.f32.mrb[18].mxu0  ;;  %v1447_v44 = vld [vmem:[#allocation4 + $0x8] sm:$0xff] (!%p2073_p13) }
 0x64f   : > { %1437 = vst.msk [vmem:[#allocation4 + $0x18] sm:$0xff] %vm923_vm4, %v1433_v20  ;;  %v2179_v24 = vpop.f32.mrb[19].mxu0 }
 0x652   : > { %v1448_v37 = vld [vmem:[#allocation4 + $0x10] sm:$0xff] }
 0x656   : > { %v1449_v43 = vld [vmem:[#allocation4 + $0x18] sm:$0xff] }
 0x683   : > { %v1457_v29 = vpop.permute.xlu0 %1456 }
 0x687   : > { %v1462_v35 = vpop.permute.xlu0 %1461 }
 0x68b   : > { %v1467_v27 = vpop.permute.xlu1 %1466 }
 0x68c   : > { %2392 = vrcp.f32 %v1467_v27 }
 0x68d   : > { %2394 = vrcp.f32 %v1457_v29 }
 0x68f   : > { %v1472_v30 = vpop.permute.xlu1 %1471 }
 0x690   : > { %2396 = vrcp.f32 %v1472_v30 }
 0x691   : > { %2398 = vrcp.f32 %v1462_v35 }
 0x696   : > { %v2393_v38 = vpop.eup %2392 }
 0x697   : > { %v2395_v40 = vpop.eup %2394  ;;  %v1479_v28 = vmul.f32 %v2393_v38, %v1448_v37 }
 0x698   : > { %v1475_v41 = vmul.f32 %v2395_v40, %v1446_v10 }
 0x69a   : > { %v2397_v45 = vpop.eup %2396  ;;  %v1482_v2 = vcombine.low %v1475_v41, %v1479_v28  ;;  %v1483_v39 = vcombine.high %v1475_v41, %v1479_v28 }
 0x69b   : > { %v2399_v46 = vpop.eup %2398  ;;  %v1481_v48 = vmul.f32 %v2397_v45, %v1449_v43  ;;  %v2386_v43 = vld [vmem:[%s3314_s9] sm:$0xff]  }
 0x69c   : > { %v1477_v3 = vmul.f32 %v2399_v46, %v1447_v44  ;;  %v1490_v7 = vrot.slane %v1482_v2, %v3039_v36  ;;  %v1497_v50 = vrot.slane %v1483_v39, %v3039_v36  ;;  %v2387_v44 = vld [vmem:[%s3314_s9 + $0x8] sm:$0xff]   ;;  %v2080_v39 = vld [vmem:[#allocation13] ss:$0 sm:$0xff] }
 0x69e   : > { %v1498_v4 = vcombine.low %v1477_v3, %v1481_v48  ;;  %v1499_v6 = vcombine.high %v1477_v3, %v1481_v48 }
 0x6a0   : > { %v1506_v51 = vrot.slane %v1498_v4, %v3039_v36  ;;  %v1513_v9 = vrot.slane %v1499_v6, %v3039_v36  ;;  %v2081_v4 = vld [vmem:[#allocation14] ss:$0 sm:$0xff] }
 0x6a2   : > { %v1514_v53 = vcombine.low %v1490_v7, %v1506_v51  ;;  %v1515_v54 = vcombine.high %v1490_v7, %v1506_v51  ;;  %v1530_v55 = vcombine.low %v1497_v50, %v1513_v9  ;;  %v1531_v56 = vcombine.high %v1497_v50, %v1513_v9  ;;  %v2388_v51 = vld [vmem:[%s3315_s10] sm:$0xff]   ;;  %v2389_v9 = vld [vmem:[%s3315_s10 + $0x8] sm:$0xff]  }
 0x6a3   : > { %2197 = vmatpush3.bf16.msra.mxu0 %v2388_v51 }
 0x6a4   : > { %v1522_v11 = vrot.slane %v1514_v53, %v3051_v42  ;;  %v1529_v57 = vrot.slane %v1515_v54, %v3051_v42  ;;  %v1538_v58 = vrot.slane %v1530_v55, %v3051_v42  ;;  %v1545_v59 = vrot.slane %v1531_v56, %v3051_v42  ;;  %2198 = vmatprep.subr.bf16.mxu0 %v2704_v26  ;;  %v2391_v53 = vld [vmem:[%s3315_s10 + $0x18] sm:$0xff]  }
 0x6a6   : > { %v1550_v61 = vcombine.low %v1522_v11, %v1529_v57  ;;  %v2074_v62 = vcombine.high %v1522_v11, %v1529_v57  ;;  %v1566_v63 = vcombine.low %v1538_v58, %v1545_v59  ;;  %v2075_v0 = vcombine.high %v1538_v58, %v1545_v59 }
 0x6a7   : > { %2199 = vmatpush3.bf16.msra.mxu0 %v2389_v9 }
 0x6a8   : > { %v1557_v1 = vrot.slane %v1550_v61, %v3039_v36  ;;  %v1565_v34 = vrot.slane %v2074_v62, %v3039_v36  ;;  %v1573_v22 = vrot.slane %v1566_v63, %v3039_v36  ;;  %v1581_v33 = vrot.slane %v2075_v0, %v3039_v36  ;;  %2200 = vmatprep.subr.bf16.mxu0 %v2704_v26 }
 0x6aa   : > { %v1583_v5 = vcombine.high %v1557_v1, %v1565_v34  ;;  %v1599_v8 = vcombine.high %v1573_v22, %v1581_v33  ;;  %v1582_v12 = vcombine.low %v1557_v1, %v1565_v34  ;;  %v1598_v13 = vcombine.low %v1573_v22, %v1581_v33 }
 0x6ab   : > { %2201 = vmatpush3.bf16.msra.mxu0 %v2390_v52 }
 0x6ac   : > { %v1597_v14 = vrot.slane %v1583_v5, %v3051_v42  ;;  %v1613_v15 = vrot.slane %v1599_v8, %v3051_v42  ;;  %v1590_v16 = vrot.slane %v1582_v12, %v3051_v42  ;;  %v1606_v36 = vrot.slane %v1598_v13, %v3051_v42  ;;  %2202 = vmatprep.subr.bf16.mxu0 %v2704_v26 }
 0x6ae   : > { %v1616_v17 = vcombine.low %v1597_v14, %v1613_v15  ;;  %v1615_v18 = vcombine.high %v1590_v16, %v1606_v36  ;;  %v1614_v19 = vcombine.low %v1590_v16, %v1606_v36  ;;  %v1617_v20 = vcombine.high %v1597_v14, %v1613_v15 }
 0x6af   : > { %2203 = vmatpush3.bf16.msra.mxu0 %v2391_v53 }
 0x6b0   : > { %1623 = vrot.lane.b32.xlu1 %v1616_v17, %s2706_s20  ;;  %1619 = vrot.lane.b32.xlu0 %v1615_v18, %s2707_s28 }
 0x6b4   : > { %1627 = vrot.lane.b32.xlu0 %v1617_v20, %s2708_s12 }
 0x722   : > { %v1620_v21 = vpop.permute.xlu0 %1619  ;;  %v1624_v23 = vpop.permute.xlu1 %1623 }
 0x723   : > { %v1630_v24 = vsel %vm923_vm4, %v1614_v19, %v1620_v21 }
 0x724   : > { %v1632_v31 = vsel %vm1631_vm9, %v1630_v24, %v1624_v23 }
 0x726   : > { %v1628_v32 = vpop.permute.xlu0 %1627 }
 0x727   : > { %v1634_v47 = vsel %vm1633_vm10, %v1632_v31, %v1628_v32 }
 0x728   : > { %v1635_v42 = vpack.c.bf16 %v1634_v47, %v1634_v47 }
 0x72a   : > { %2185 = vmatmul.mubr.msk.bf16.vlgmr.msra.gmra.mrb[0].mxu1 %vm528_vm2, %v1635_v42 }
 0x72b   : > { %2192 = vmatprep.mubr.msk.bf16.mxu1 %vm2705_vm8, %v2704_v26  ;;  %2189 = vmatpush3.bf16.msra.mxu1 %v2386_v43 }
 0x72c   : > { %2190 = vmatprep.subr.bf16.mxu1 %v2704_v26 }
 0x72f   : > { %2191 = vmatpush3.bf16.msra.mxu1 %v2387_v44 }
 0x7fd   : > { %v1696_v49 = vpop.f32.mrb[0].mxu1 }
 0x7fe   : > { %v1697_v27 = vadd.f32 %v2076_v25, %v1696_v49  ;;  %v2186_v29 = vpop.f32.mrb[1].mxu1 }
 0x7ff   : > { %v1699_v30 = vpop.f32.mrb[2].mxu1 }
 0x800   : > { %v2187_v35 = vpop.f32.mrb[3].mxu1  ;;  %v1704_v37 = vsel %vm528_vm2, %v1697_v27, 0.0 }
 0x801   : > { %1705 = vadd.xlane.f32.xlu1 %v1704_v37 }
 0x88e   : > { %v1706_v10 = vpop.xlane.xlu1 %1705 }
 0x88f   : > { %v1707_v38 = vmul.f32 0.03125, %v1706_v10 }
 0x891   : > { %v1708_v40 = vsub.f32 %v1697_v27, %v1707_v38 }
 0x893   : > { %v1709_v28 = vmul.f32 %v1708_v40, %v1708_v40 }
 0x895   : > { %v1710_v41 = vsel %vm528_vm2, %v1709_v28, 0.0 }
 0x896   : > { %1711 = vadd.xlane.f32.xlu0 %v1710_v41 }
 0x923   : > { %v1712_v45 = vpop.xlane.xlu0 %1711 }
 0x924   : > { %v1713_v46 = vmul.f32 0.03125, %v1712_v45 }
 0x926   : > { %v1714_v48 = vadd.f32 1e-05, %v1713_v46 }
 0x928   : > { %2400 = vrsqrt.f32 %v1714_v48 }
 0x932   : > { %v2401_v2 = vpop.eup %2400 }
 0x933   : > { %v1716_v3 = vmul.f32 %v2401_v2, %v1708_v40 }
 0x935   : > { %v1723_v6 = vmul.f32 %v2080_v39, %v1716_v3 }
 0x937   : > { %v1730_v7 = vadd.f32 %v2081_v4, %v1723_v6 }
 0x939   : > { %v1731_v50 = vpack.c.bf16 %v1730_v7, %v1730_v7 }
 0x93b   : > { %2193 = vmatmul.mubr.msk.bf16.vlgmr.msra.gmra.mrb[4].mxu1 %vm528_vm2, %v1731_v50 }
 0xa0e   : > { %v1785_v54 = vpop.f32.mrb[4].mxu1 }
 0xa0f   : > { %v1792_v55 = vmul.f32 0.044715, %v1785_v54  ;;  %v2194_v56 = vpop.f32.mrb[5].mxu1  ;;  %v1791_v63 = vmul.f32 0.5, %v1785_v54 }
 0xa10   : > { %v1788_v11 = vpop.f32.mrb[6].mxu1 }
 0xa11   : > { %v1793_v57 = vmul.f32 %v1792_v55, %v1785_v54  ;;  %v2195_v58 = vpop.f32.mrb[7].mxu1 }
 0xa13   : > { %v1794_v59 = vmul.f32 %v1793_v57, %v1785_v54 }
 0xa15   : > { %v1795_v60 = vadd.f32 %v1794_v59, %v1785_v54 }
 0xa17   : > { %v1796_v61 = vmul.f32 0.7978846, %v1795_v60 }
 0xa19   : > { %2402 = vtanh.f32 %v1796_v61 }
 0xa23   : > { %v2403_v62 = vpop.eup %2402 }
 0xa24   : > { %v1798_v0 = vadd.f32 1.0, %v2403_v62 }
 0xa26   : > { %v1799_v1 = vmul.f32 %v1798_v0, %v1791_v63 }
 0xa28   : > { %v1800_v34 = vpack.c.bf16 %v1799_v1, %v1799_v1 }
 0xa2a   : > { %2205 = vmatmul.mubr.msk.bf16.vlgmr.msra.gmra.mrb[0].mxu0 %vm1833_vm11, %v1800_v34 }
 0xafd   : > { %v1871_v26 = vpop.f32.mrb[0].mxu0 }
 0xafe   : > { %1877 = vst.msk [vmem:[%s497_s16] sm:$0xff] %vm528_vm2, %v1871_v26  ;;  %v2206_v22 = vpop.f32.mrb[1].mxu0 }
 0xaff   : > { %v1874_v33 = vpop.f32.mrb[2].mxu0 }
 0xb00   : > { %v2207_v5 = vpop.f32.mrb[3].mxu0 }
 0xb01 PF: > { %s3361_s25 = sld [smem:[#allocation28_spill]]  ;;  %s2091_s29 = sshll.u32 %s2670_s21, 7 }
 0xb02   : > { %s3362_s12 = sld [smem:[#allocation34_spill]]  ;;  %s1893_s11 = sshll.u32 %s497_s16, 4  ;;  %s1894_s11 = int_to_ptr.vmem [resolvable:$true] %s1893_s11 }
 0xb03   : > { %s1879_s15 = scalar_lea.sflag [#allocation7], %s495_s13  ;;  %s2572_s4 = scalar_lea.vmem %s1894_s11, 128 }
 0xb04   : > { %p2573_p1 = scmp.ne.s32.totalorder %s1894_s11, %s2572_s4  ;;  %s2709_s17 = smov [#allocation16]  }
 0xb05   : > { %s2576_s23 = sshll.u32 %s2709_s17, 4  ;;  %s2577_s23 = int_to_ptr.vmem [resolvable:$false] %s2576_s23 }
 0xb06   : > { %s2578_s22 = scalar_lea.vmem %s2577_s23, 256  ;;  %p2579_p7 = scmp.lt.s32.totalorder %s1894_s11, %s2577_s23 }
 0xb07   : > { %p3363_p4 = scmp.ne.s32.totalorder %s3361_s25, 0  ;;  %p2580_p8 = scmp.lt.s32.totalorder %s2578_s22, %s2572_s4 }
 0xb08   : > { %s3254_s1 = scalar_lea.hbm %s3362_s12, %s2091_s29 }
 0xb09   : > { %p2574_p5 = pnand %p2573_p1, %p3363_p4  ;;  %p2581_p11 = por %p2580_p8, %p2579_p7 }
 0xb0b   : > { %p2575_p6 = pneg %p2574_p5 }
 0xb0d   : > { %p2582_p12 = pnand %p2581_p11, %p2575_p6 }
 0xb0f   : > { %2585 = shalt.err (!%p2582_p12)
}
 0xb10   : > { %s2586_s21 = scalar_lea.hbm %s3254_s1, 128  ;;  %s2590_s16 = scalar_lea.hbm %s3362_s12, 256 }
 0xb11   : > { %p2587_p3 = scmp.ne.s32.totalorder %s3254_s1, %s2586_s21  ;;  %p2591_p2 = scmp.lt.u32.totalorder %s3254_s1, %s3362_s12 }
 0xb12   : > { %p2592_p10 = scmp.lt.u32.totalorder %s2590_s16, %s2586_s21  ;;  %p2594_p1 = scmp.lt.u32.totalorder %s2586_s21, %s3254_s1 }
 0xb13   : > { %p2588_p9 = pnand %p2587_p3, %p3363_p4 }
 0xb14   : > { %p2593_p13 = por %p2592_p10, %p2591_p2 }
 0xb15   : > { %p2589_p0 = pneg %p2588_p9 }
 0xb16   : > { %p2595_p5 = por %p2594_p1, %p2593_p13 }
 0xb18   : > { %p2596_p6 = pnand %p2595_p5, %p2589_p0 }
 0xb1a   : > { %2599 = shalt.err (!%p2596_p6)
}
 0xb1b   : > { %2233 = dma.vmem_to_hbm [thread:$0]  (%p3363_p4), %s1894_s11, 128, %s3254_s1, %s1879_s15  }
 0xb1c PF: > { %s3364_s24 = sld [smem:[#allocation26_spill]]  ;;  %s3365_s27 = sld [smem:[#allocation22_spill]] }
 0xb1d   : > { %s3366_s30 = sld [smem:[#allocation30_spill]] }
 0xb22   : > { %p2270_p7 = scmp.ge.s32.totalorder %s3364_s24, 2  ;;  %s1905_s29 = sand.u32 1, %s3365_s27  }
 0xb23   : > { %p3367_p8 = scmp.ne.s32.totalorder %s3366_s30, 0  ;;  %s1906_s20 = scalar_lea.sflag [#allocation7], %s1905_s29 }
 0xb25   : > { %p2255_p11 = pnand %p2270_p7, %p3367_p8 }
 0xb27   : > { %2649 = dma.done.wait (!%p2255_p11), %s1906_s20, 128  }
 0xb28   : > { %2651 = vsyncadd (!%p2255_p11), %s1906_s20, 4294967168  ;;  %s28_s24 = sadd.s32 1, %s3364_s24   ;;  %s3368_s28 = sld [smem:[#allocation23_spill]] }
 0xb29   : > { %p25_p12 = scmp.ge.s32.totalorder %s28_s24, 8   ;;  %s3369_s19 = sld [smem:[#allocation31_spill]] }
 0xb2a   : > { %s3370_s20 = sld [smem:[#allocation24_spill]]  ;;  %s3371_s21 = sld [smem:[#allocation25_spill]] }
 0xb2b   : > { %s3372_s22 = sld [smem:[#allocation27_spill]]  ;;  %s3373_s23 = sld [smem:[#allocation29_spill]] }
 0xb2c   : > { %s3374_s17 = smov %s2658_s18  ;;  %27 = sbr.rel (!%p25_p12) target bundleno = 13 (0xd), region = 133 }
 0xb2e   : > { %s3375_s18 = smov %s3368_s28 }
 0xb33   :  { %1911 = vsyncpa [#allocation6], 1 }
 0xb34   :  { %1913 = vsyncpa [#allocation6 + $0x1], 1 }
 0xb35   :  { %1914 = vsyncpa [#allocation9], 1 }
 0xb36   :  { %1915 = vsyncpa [#allocation12], 1 }
 0xb37   :  { %1916 = vsyncpa [#allocation15], 1 }
 0xb38   :  { %1917 = vsyncpa [#allocation7], 1 }
 0xb39   :  { %1919 = vsyncpa [#allocation7 + $0x1], 1 }

</bundles_post_ra>
